<compile_context>
chip_gen: v5e
topology: v5e:2x2
jax: 0.10.0
libtpu: 0.0.40
codegen_flags: <defaults>
</compile_context>

<pallas_src>
import jax
import jax.numpy as jnp
import numpy as np
from jax.experimental import pallas as pl
from jax.experimental.pallas import tpu as pltpu

# ----------------------------- config (small demo, module-consistent) -------
BATCH = 2
BP = 8                   # batch padded to one full sublane tile
SEQ = 8
INPUT_SIZE = 1           # as in the module
HIDDEN = 100             # module's hidden_size
HP = 128                 # hidden padded to a full 128-lane vreg
NUM_LAYERS = 3           # module uses 10; kept small for the demo
OUTPUT_SIZE = 1


def make_lstm_kernel(BPc, T, HPc):
    G3 = 3 * HPc

    def kernel(x_ref, wih_ref, whh_ref, b_ref, wfc_ref, bfc_ref, out_ref,
               hseq, gin):
        # grid axis 0 = layer index; scratch (hseq/gin) persists across layers.
        layer = pl.program_id(0)

        # Layer 0 input = x (already batch/feature padded + t-major-flattened).
        @pl.when(layer == 0)
        def _():
            hseq[...] = x_ref[...]

        wih = wih_ref[0]                     # (HP, 4*HP) bf16
        whh = whh_ref[0]                     # (HP, 4*HP) bf16
        b = b_ref[0]                         # (1, 4*HP)  f32 (= b_ih + b_hh)

        # Hoisted input projection for ALL timesteps of this layer:
        # one (T*BP, HP) x (HP, 4*HP) MXU matmul, bias folded in, f32 acc.
        gin[...] = jnp.dot(hseq[...].astype(jnp.bfloat16), wih,
                           preferred_element_type=jnp.float32) + b

        # h0 = c0 = 0 per layer (matches the module's forward()); state is
        # carried as vreg values through the statically unrolled time loop.
        h = jnp.zeros((BPc, HPc), jnp.float32)
        c = jnp.zeros((BPc, HPc), jnp.float32)

        # Serial recurrence: per step only h @ W_hh is on the critical path.
        # T is small here so a static unroll keeps every slice offset static
        # and tile-aligned; for long sequences switch to
        # lax.fori_loop(..., unroll=<small>) with the same (BP, *) tiles.
        for t in range(T):
            gates = gin[pl.ds(t * BPc, BPc), :] + jnp.dot(
                h.astype(jnp.bfloat16), whh,
                preferred_element_type=jnp.float32)            # (BP, 4*HP) f32
            # gate order [i, f, o, g]: one sigmoid over 3*HP lanes, one tanh.
            sig = jax.nn.sigmoid(gates[:, :G3])
            i_g = sig[:, 0 * HPc:1 * HPc]
            f_g = sig[:, 1 * HPc:2 * HPc]
            o_g = sig[:, 2 * HPc:3 * HPc]
            g_g = jnp.tanh(gates[:, G3:])
            c = f_g * c + i_g * g_g
            h = o_g * jnp.tanh(c)
            # t-major layer-output buffer -> next layer's batched projection.
            # Offset t*BP is a multiple of 8: full aligned f32 tile store.
            hseq[pl.ds(t * BPc, BPc), :] = h

        # Final Linear on the last timestep of the last layer.
        @pl.when(layer == pl.num_programs(0) - 1)
        def _():
            out_ref[...] = jnp.dot(h, wfc_ref[...],
                                   preferred_element_type=jnp.float32) + bfc_ref[0]

    return kernel


def sine_lstm_forward(x_flat, w_ih, w_hh, b, w_fc, b_fc):
    """x_flat: (T*BP, HP) f32 (t-major, batch-padded); returns (BATCH, OUT) f32."""
    TB, HPc = x_flat.shape
    L = w_ih.shape[0]
    T = TB // BP
    G = 4 * HPc
    kernel = make_lstm_kernel(BP, T, HPc)

    out = pl.pallas_call(
        kernel,
        out_shape=jax.ShapeDtypeStruct((BP, OUTPUT_SIZE), jnp.float32),
        grid=(L,),
        in_specs=[
            pl.BlockSpec((TB, HPc), lambda l: (0, 0)),        # x (stays resident)
            pl.BlockSpec((1, HPc, G), lambda l: (l, 0, 0)),   # W_ih[l] (pipelined)
            pl.BlockSpec((1, HPc, G), lambda l: (l, 0, 0)),   # W_hh[l] (pipelined)
            pl.BlockSpec((1, 1, G), lambda l: (l, 0, 0)),     # bias[l]
            pl.BlockSpec((HPc, OUTPUT_SIZE), lambda l: (0, 0)),       # fc weight
            pl.BlockSpec(memory_space=pltpu.MemorySpace.SMEM),        # fc bias
        ],
        out_specs=pl.BlockSpec((BP, OUTPUT_SIZE), lambda l: (0, 0)),
        scratch_shapes=[
            pltpu.VMEM((TB, HPc), jnp.float32),   # layer-to-layer sequence (t-major)
            pltpu.VMEM((TB, G), jnp.float32),     # hoisted input projection
        ],
        compiler_params=pltpu.CompilerParams(
            dimension_semantics=("arbitrary",)),  # layers are sequential (carried state)
    )(x_flat, w_ih, w_hh, b, w_fc, b_fc)
    return out[:BATCH]


# ----------------------------- references -----------------------------------
def reference_packed(x_flat, w_ih, w_hh, b, w_fc, b_fc, BPc, T, HPc):
    """Plain-JAX mirror of the kernel's exact numerics (padded, bf16 operands)."""
    seq = x_flat                                     # (T*BP, HP) f32, t-major
    L = w_ih.shape[0]
    h = jnp.zeros((BPc, HPc), jnp.float32)
    for l in range(L):
        gin = jnp.dot(seq.astype(jnp.bfloat16), w_ih[l],
                      preferred_element_type=jnp.float32) + b[l]
        h = jnp.zeros((BPc, HPc), jnp.float32)
        c = jnp.zeros((BPc, HPc), jnp.float32)
        outs = []
        for t in range(T):
            g = gin[t * BPc:(t + 1) * BPc] + jnp.dot(
                h.astype(jnp.bfloat16), w_hh[l],
                preferred_element_type=jnp.float32)
            i_g = jax.nn.sigmoid(g[:, :HPc])
            f_g = jax.nn.sigmoid(g[:, HPc:2 * HPc])
            o_g = jax.nn.sigmoid(g[:, 2 * HPc:3 * HPc])
            g_g = jnp.tanh(g[:, 3 * HPc:])
            c = f_g * c + i_g * g_g
            h = o_g * jnp.tanh(c)
            outs.append(h)
        seq = jnp.concatenate(outs, axis=0)          # t-major again
    return jnp.dot(h, w_fc, preferred_element_type=jnp.float32) + b_fc


def reference_true(x, params, w_fc, b_fc):
    """Pure-f32, unpadded stacked-LSTM + Linear (module semantics)."""
    Bb, Tt, _ = x.shape
    seq = x
    for (Wih, Whh, bih, bhh) in params:
        h = jnp.zeros((Bb, HIDDEN), jnp.float32)
        c = jnp.zeros((Bb, HIDDEN), jnp.float32)
        outs = []
        for t in range(Tt):
            xt = seq[:, t, :]
            i = jax.nn.sigmoid(xt @ Wih["i"] + h @ Whh["i"] + bih["i"] + bhh["i"])
            f = jax.nn.sigmoid(xt @ Wih["f"] + h @ Whh["f"] + bih["f"] + bhh["f"])
            g = jnp.tanh(xt @ Wih["g"] + h @ Whh["g"] + bih["g"] + bhh["g"])
            o = jax.nn.sigmoid(xt @ Wih["o"] + h @ Whh["o"] + bih["o"] + bhh["o"])
            c = f * c + i * g
            h = o * jnp.tanh(c)
            outs.append(h)
        seq = jnp.stack(outs, axis=1)
    return seq[:, -1, :] @ w_fc + b_fc


# ----------------------------- main ------------------------------------------
if __name__ == "__main__":
    B, T, L = BATCH, SEQ, NUM_LAYERS
    key = jax.random.PRNGKey(0)
    keys = jax.random.split(key, L + 3)
    bound = 1.0 / np.sqrt(HIDDEN)    # PyTorch LSTM/Linear default uniform bound

    def uni(k, shape):
        return jax.random.uniform(k, shape, jnp.float32, -bound, bound)

    # True-size per-gate parameters (PyTorch gate names i, f, g, o).
    params = []
    for l in range(L):
        in_dim = INPUT_SIZE if l == 0 else HIDDEN
        gk = jax.random.split(keys[l], 16)
        Wih = {g: uni(gk[j], (in_dim, HIDDEN)) for j, g in enumerate("ifgo")}
        Whh = {g: uni(gk[4 + j], (HIDDEN, HIDDEN)) for j, g in enumerate("ifgo")}
        bih = {g: uni(gk[8 + j], (HIDDEN,)) for j, g in enumerate("ifgo")}
        bhh = {g: uni(gk[12 + j], (HIDDEN,)) for j, g in enumerate("ifgo")}
        params.append((Wih, Whh, bih, bhh))
    w_fc = uni(keys[L], (HIDDEN, OUTPUT_SIZE))
    b_fc = uni(keys[L + 1], (OUTPUT_SIZE,))
    x = jax.random.normal(keys[L + 2], (B, T, INPUT_SIZE), jnp.float32)

    # ---- pack for the kernel: pad H->HP, gate order [i, f, o, g], bf16 mats.
    KERNEL_GATES = ("i", "f", "o", "g")      # sigmoid gates first, tanh last

    def pad_cols(w):  # (r, HIDDEN) -> (r, HP), zero pad
        return jnp.pad(w, ((0, 0), (0, HP - w.shape[1])))

    def pad_rows(w):  # (r, c) -> (HP, c), zero pad
        return jnp.pad(w, ((0, HP - w.shape[0]), (0, 0)))

    wih_list, whh_list, b_list = [], [], []
    for (Wih, Whh, bih, bhh) in params:
        wih_l = pad_rows(jnp.concatenate([pad_cols(Wih[g]) for g in KERNEL_GATES], axis=1))
        whh_l = pad_rows(jnp.concatenate([pad_cols(Whh[g]) for g in KERNEL_GATES], axis=1))
        b_l = jnp.concatenate([jnp.pad(bih[g] + bhh[g], (0, HP - HIDDEN))
                               for g in KERNEL_GATES]).reshape(1, 4 * HP)
        wih_list.append(wih_l)
        whh_list.append(whh_l)
        b_list.append(b_l)

    w_ih_p = jnp.stack(wih_list).astype(jnp.bfloat16)   # (L, HP, 4*HP)
    w_hh_p = jnp.stack(whh_list).astype(jnp.bfloat16)   # (L, HP, 4*HP)
    b_p = jnp.stack(b_list)                              # (L, 1, 4*HP) f32
    w_fc_p = pad_rows(w_fc)                              # (HP, 1) f32
    # x: (B, T, 1) -> pad batch to BP and features to HP -> t-major flatten.
    x_pad = jnp.pad(x, ((0, BP - B), (0, 0), (0, HP - INPUT_SIZE)))
    x_flat = jnp.transpose(x_pad, (1, 0, 2)).reshape(T * BP, HP)   # f32

    # ---- run kernel.
    out = sine_lstm_forward(x_flat, w_ih_p, w_hh_p, b_p, w_fc_p, b_fc)
    out = jax.block_until_ready(out)

    # Tight check: same padded/bf16 numerics as the kernel.
    ref_p = reference_packed(x_flat, w_ih_p, w_hh_p, b_p, w_fc_p, b_fc, BP, T, HP)
    np.testing.assert_allclose(np.asarray(out), np.asarray(ref_p)[:B],
                               rtol=2e-3, atol=2e-3)

    # Loose check: unpadded pure-f32 module semantics (bf16 matmul operands
    # introduce small differences).
    ref_t = reference_true(x, params, w_fc, b_fc)
    np.testing.assert_allclose(np.asarray(out), np.asarray(ref_t),
                               rtol=5e-2, atol=5e-2)

    print("KERNEL_OK")
</pallas_src>

<mosaic_0001>
module attributes {stable_mosaic.version = 11 : i64} {
  func.func @kernel(%arg0: i32, %arg1: memref<64x128xf32, #tpu.memory_space<vmem>>, %arg2: memref<1x128x512xbf16, #tpu.memory_space<vmem>>, %arg3: memref<1x128x512xbf16, #tpu.memory_space<vmem>>, %arg4: memref<1x1x512xf32, #tpu.memory_space<vmem>>, %arg5: memref<128x1xf32, #tpu.memory_space<vmem>>, %arg6: memref<1xf32, #tpu.memory_space<smem>>, %arg7: memref<8x1xf32, #tpu.memory_space<vmem>>, %arg8: memref<64x128xf32, #tpu.memory_space<vmem>>, %arg9: memref<64x512xf32, #tpu.memory_space<vmem>>) attributes {dimension_semantics = [#tpu.dimension_semantics<arbitrary>], iteration_bounds = array<i64: 3>, scalar_prefetch = 0 : i64, scratch_operands = 2 : i64, tpu.core_type = #tpu.core_type<tc>, window_params = [{pipeline_mode = #tpu.pipeline_mode<synchronous>, transform_indices = @transform_0, window_bounds = array<i64: 64, 128>}, {transform_indices = @transform_1, window_bounds = array<i64: 1, 128, 512>}, {transform_indices = @transform_2, window_bounds = array<i64: 1, 128, 512>}, {transform_indices = @transform_3, window_bounds = array<i64: 1, 1, 512>}, {pipeline_mode = #tpu.pipeline_mode<synchronous>, transform_indices = @transform_4, window_bounds = array<i64: 128, 1>}, {transform_indices = @transform_5, window_bounds = array<i64: 1>}, {pipeline_mode = #tpu.pipeline_mode<synchronous>, transform_indices = @transform_6, window_bounds = array<i64: 8, 1>}]} {
    %c0_i32 = arith.constant 0 : i32
    %0 = arith.cmpi eq, %arg0, %c0_i32 : i32
    %1 = arith.extui %0 : i1 to i32
    %c0_i32_0 = arith.constant 0 : i32
    %2 = arith.cmpi ne, %1, %c0_i32_0 : i32
    scf.if %2 {
      %c0_57 = arith.constant 0 : index
      %c0_58 = arith.constant 0 : index
      %188 = vector.load %arg1[%c0_57, %c0_58] : memref<64x128xf32, #tpu.memory_space<vmem>>, vector<64x128xf32>
      %c0_59 = arith.constant 0 : index
      %c0_60 = arith.constant 0 : index
      %189 = vector.load %arg8[%c0_59, %c0_60] : memref<64x128xf32, #tpu.memory_space<vmem>>, vector<64x128xf32>
      tpu.vector_store %arg8[%c0_59, %c0_60], %188 {strides = array<i32>} : memref<64x128xf32, #tpu.memory_space<vmem>>, vector<64x128xf32>,
    } else {
    }
    %c0 = arith.constant 0 : index
    %c0_1 = arith.constant 0 : index
    %c0_2 = arith.constant 0 : index
    %3 = vector.load %arg2[%c0, %c0_1, %c0_2] : memref<1x128x512xbf16, #tpu.memory_space<vmem>>, vector<1x128x512xbf16>
    %4 = vector.shape_cast %3 : vector<1x128x512xbf16> to vector<128x512xbf16>
    %c0_3 = arith.constant 0 : index
    %c0_4 = arith.constant 0 : index
    %c0_5 = arith.constant 0 : index
    %5 = vector.load %arg3[%c0_3, %c0_4, %c0_5] : memref<1x128x512xbf16, #tpu.memory_space<vmem>>, vector<1x128x512xbf16>
    %6 = vector.shape_cast %5 : vector<1x128x512xbf16> to vector<128x512xbf16>
    %c0_6 = arith.constant 0 : index
    %c0_7 = arith.constant 0 : index
    %c0_8 = arith.constant 0 : index
    %7 = vector.load %arg4[%c0_6, %c0_7, %c0_8] : memref<1x1x512xf32, #tpu.memory_space<vmem>>, vector<1x1x512xf32>
    %8 = vector.shape_cast %7 : vector<1x1x512xf32> to vector<1x512xf32>
    %c0_9 = arith.constant 0 : index
    %c0_10 = arith.constant 0 : index
    %9 = vector.load %arg8[%c0_9, %c0_10] : memref<64x128xf32, #tpu.memory_space<vmem>>, vector<64x128xf32>
    %10 = arith.truncf %9 : vector<64x128xf32> to vector<64x128xbf16>
    %cst = arith.constant dense<0.000000e+00> : vector<64x512xf32>
    %11 = tpu.matmul %10, %4, %cst {dimension_numbers = #tpu.dot_dimension_numbers<[1], [0], [0], [1], [0, 0, 1, 1], [], []>} : vector<64x128xbf16>, vector<128x512xbf16>, vector<64x512xf32> -> vector<64x512xf32>
    %12 = vector.broadcast %8 : vector<1x512xf32> to vector<64x512xf32>
    %13 = arith.addf %11, %12 : vector<64x512xf32>
    %c0_11 = arith.constant 0 : index
    %c0_12 = arith.constant 0 : index
    %14 = vector.load %arg9[%c0_11, %c0_12] : memref<64x512xf32, #tpu.memory_space<vmem>>, vector<64x512xf32>
    tpu.vector_store %arg9[%c0_11, %c0_12], %13 {strides = array<i32>} : memref<64x512xf32, #tpu.memory_space<vmem>>, vector<64x512xf32>,
    %cst_13 = arith.constant 0.000000e+00 : f32
    %15 = vector.broadcast %cst_13 : f32 to vector<8x128xf32>
    %cst_14 = arith.constant 0.000000e+00 : f32
    %16 = vector.broadcast %cst_14 : f32 to vector<8x128xf32>
    %c0_15 = arith.constant 0 : index
    %c0_16 = arith.constant 0 : index
    %17 = vector.load %arg9[%c0_15, %c0_16] : memref<64x512xf32, #tpu.memory_space<vmem>>, vector<8x512xf32>
    %18 = arith.truncf %15 : vector<8x128xf32> to vector<8x128xbf16>
    %cst_17 = arith.constant dense<0.000000e+00> : vector<8x512xf32>
    %19 = tpu.matmul %18, %6, %cst_17 {dimension_numbers = #tpu.dot_dimension_numbers<[1], [0], [0], [1], [0, 0, 1, 1], [], []>} : vector<8x128xbf16>, vector<128x512xbf16>, vector<8x512xf32> -> vector<8x512xf32>
    %20 = arith.addf %17, %19 : vector<8x512xf32>
    %21 = vector.extract_strided_slice %20 {offsets = [0, 0], sizes = [8, 384], strides = [1, 1]} : vector<8x512xf32> to vector<8x384xf32>
    %22 = arith.negf %21 : vector<8x384xf32>
    %23 = math.exp %22 : vector<8x384xf32>
    %cst_18 = arith.constant 1.000000e+00 : f32
    %24 = vector.broadcast %cst_18 : f32 to vector<8x384xf32>
    %25 = arith.addf %24, %23 : vector<8x384xf32>
    %26 = arith.divf %24, %25 : vector<8x384xf32>
    %27 = vector.extract_strided_slice %26 {offsets = [0, 0], sizes = [8, 128], strides = [1, 1]} : vector<8x384xf32> to vector<8x128xf32>
    %28 = vector.extract_strided_slice %26 {offsets = [0, 128], sizes = [8, 128], strides = [1, 1]} : vector<8x384xf32> to vector<8x128xf32>
    %29 = vector.extract_strided_slice %26 {offsets = [0, 256], sizes = [8, 128], strides = [1, 1]} : vector<8x384xf32> to vector<8x128xf32>
    %30 = vector.extract_strided_slice %20 {offsets = [0, 384], sizes = [8, 128], strides = [1, 1]} : vector<8x512xf32> to vector<8x128xf32>
    %31 = math.tanh %30 : vector<8x128xf32>
    %32 = arith.mulf %28, %16 : vector<8x128xf32>
    %33 = arith.mulf %27, %31 : vector<8x128xf32>
    %34 = arith.addf %32, %33 : vector<8x128xf32>
    %35 = math.tanh %34 : vector<8x128xf32>
    %36 = arith.mulf %29, %35 : vector<8x128xf32>
    %c0_19 = arith.constant 0 : index
    %c0_20 = arith.constant 0 : index
    %37 = vector.load %arg8[%c0_19, %c0_20] : memref<64x128xf32, #tpu.memory_space<vmem>>, vector<8x128xf32>
    tpu.vector_store %arg8[%c0_19, %c0_20], %36 {strides = array<i32>} : memref<64x128xf32, #tpu.memory_space<vmem>>, vector<8x128xf32>,
    %c8 = arith.constant 8 : index
    %c0_21 = arith.constant 0 : index
    %38 = vector.load %arg9[%c8, %c0_21] : memref<64x512xf32, #tpu.memory_space<vmem>>, vector<8x512xf32>
    %39 = arith.truncf %36 : vector<8x128xf32> to vector<8x128xbf16>
    %cst_22 = arith.constant dense<0.000000e+00> : vector<8x512xf32>
    %40 = tpu.matmul %39, %6, %cst_22 {dimension_numbers = #tpu.dot_dimension_numbers<[1], [0], [0], [1], [0, 0, 1, 1], [], []>} : vector<8x128xbf16>, vector<128x512xbf16>, vector<8x512xf32> -> vector<8x512xf32>
    %41 = arith.addf %38, %40 : vector<8x512xf32>
    %42 = vector.extract_strided_slice %41 {offsets = [0, 0], sizes = [8, 384], strides = [1, 1]} : vector<8x512xf32> to vector<8x384xf32>
    %43 = arith.negf %42 : vector<8x384xf32>
    %44 = math.exp %43 : vector<8x384xf32>
    %cst_23 = arith.constant 1.000000e+00 : f32
    %45 = vector.broadcast %cst_23 : f32 to vector<8x384xf32>
    %46 = arith.addf %45, %44 : vector<8x384xf32>
    %47 = arith.divf %45, %46 : vector<8x384xf32>
    %48 = vector.extract_strided_slice %47 {offsets = [0, 0], sizes = [8, 128], strides = [1, 1]} : vector<8x384xf32> to vector<8x128xf32>
    %49 = vector.extract_strided_slice %47 {offsets = [0, 128], sizes = [8, 128], strides = [1, 1]} : vector<8x384xf32> to vector<8x128xf32>
    %50 = vector.extract_strided_slice %47 {offsets = [0, 256], sizes = [8, 128], strides = [1, 1]} : vector<8x384xf32> to vector<8x128xf32>
    %51 = vector.extract_strided_slice %41 {offsets = [0, 384], sizes = [8, 128], strides = [1, 1]} : vector<8x512xf32> to vector<8x128xf32>
    %52 = math.tanh %51 : vector<8x128xf32>
    %53 = arith.mulf %49, %34 : vector<8x128xf32>
    %54 = arith.mulf %48, %52 : vector<8x128xf32>
    %55 = arith.addf %53, %54 : vector<8x128xf32>
    %56 = math.tanh %55 : vector<8x128xf32>
    %57 = arith.mulf %50, %56 : vector<8x128xf32>
    %c8_24 = arith.constant 8 : index
    %c0_25 = arith.constant 0 : index
    %58 = vector.load %arg8[%c8_24, %c0_25] : memref<64x128xf32, #tpu.memory_space<vmem>>, vector<8x128xf32>
    tpu.vector_store %arg8[%c8_24, %c0_25], %57 {strides = array<i32>} : memref<64x128xf32, #tpu.memory_space<vmem>>, vector<8x128xf32>,
    %c16 = arith.constant 16 : index
    %c0_26 = arith.constant 0 : index
    %59 = vector.load %arg9[%c16, %c0_26] : memref<64x512xf32, #tpu.memory_space<vmem>>, vector<8x512xf32>
    %60 = arith.truncf %57 : vector<8x128xf32> to vector<8x128xbf16>
    %cst_27 = arith.constant dense<0.000000e+00> : vector<8x512xf32>
    %61 = tpu.matmul %60, %6, %cst_27 {dimension_numbers = #tpu.dot_dimension_numbers<[1], [0], [0], [1], [0, 0, 1, 1], [], []>} : vector<8x128xbf16>, vector<128x512xbf16>, vector<8x512xf32> -> vector<8x512xf32>
    %62 = arith.addf %59, %61 : vector<8x512xf32>
    %63 = vector.extract_strided_slice %62 {offsets = [0, 0], sizes = [8, 384], strides = [1, 1]} : vector<8x512xf32> to vector<8x384xf32>
    %64 = arith.negf %63 : vector<8x384xf32>
    %65 = math.exp %64 : vector<8x384xf32>
    %cst_28 = arith.constant 1.000000e+00 : f32
    %66 = vector.broadcast %cst_28 : f32 to vector<8x384xf32>
    %67 = arith.addf %66, %65 : vector<8x384xf32>
    %68 = arith.divf %66, %67 : vector<8x384xf32>
    %69 = vector.extract_strided_slice %68 {offsets = [0, 0], sizes = [8, 128], strides = [1, 1]} : vector<8x384xf32> to vector<8x128xf32>
    %70 = vector.extract_strided_slice %68 {offsets = [0, 128], sizes = [8, 128], strides = [1, 1]} : vector<8x384xf32> to vector<8x128xf32>
    %71 = vector.extract_strided_slice %68 {offsets = [0, 256], sizes = [8, 128], strides = [1, 1]} : vector<8x384xf32> to vector<8x128xf32>
    %72 = vector.extract_strided_slice %62 {offsets = [0, 384], sizes = [8, 128], strides = [1, 1]} : vector<8x512xf32> to vector<8x128xf32>
    %73 = math.tanh %72 : vector<8x128xf32>
    %74 = arith.mulf %70, %55 : vector<8x128xf32>
    %75 = arith.mulf %69, %73 : vector<8x128xf32>
    %76 = arith.addf %74, %75 : vector<8x128xf32>
    %77 = math.tanh %76 : vector<8x128xf32>
    %78 = arith.mulf %71, %77 : vector<8x128xf32>
    %c16_29 = arith.constant 16 : index
    %c0_30 = arith.constant 0 : index
    %79 = vector.load %arg8[%c16_29, %c0_30] : memref<64x128xf32, #tpu.memory_space<vmem>>, vector<8x128xf32>
    tpu.vector_store %arg8[%c16_29, %c0_30], %78 {strides = array<i32>} : memref<64x128xf32, #tpu.memory_space<vmem>>, vector<8x128xf32>,
    %c24 = arith.constant 24 : index
    %c0_31 = arith.constant 0 : index
    %80 = vector.load %arg9[%c24, %c0_31] : memref<64x512xf32, #tpu.memory_space<vmem>>, vector<8x512xf32>
    %81 = arith.truncf %78 : vector<8x128xf32> to vector<8x128xbf16>
    %cst_32 = arith.constant dense<0.000000e+00> : vector<8x512xf32>
    %82 = tpu.matmul %81, %6, %cst_32 {dimension_numbers = #tpu.dot_dimension_numbers<[1], [0], [0], [1], [0, 0, 1, 1], [], []>} : vector<8x128xbf16>, vector<128x512xbf16>, vector<8x512xf32> -> vector<8x512xf32>
    %83 = arith.addf %80, %82 : vector<8x512xf32>
    %84 = vector.extract_strided_slice %83 {offsets = [0, 0], sizes = [8, 384], strides = [1, 1]} : vector<8x512xf32> to vector<8x384xf32>
    %85 = arith.negf %84 : vector<8x384xf32>
    %86 = math.exp %85 : vector<8x384xf32>
    %cst_33 = arith.constant 1.000000e+00 : f32
    %87 = vector.broadcast %cst_33 : f32 to vector<8x384xf32>
    %88 = arith.addf %87, %86 : vector<8x384xf32>
    %89 = arith.divf %87, %88 : vector<8x384xf32>
    %90 = vector.extract_strided_slice %89 {offsets = [0, 0], sizes = [8, 128], strides = [1, 1]} : vector<8x384xf32> to vector<8x128xf32>
    %91 = vector.extract_strided_slice %89 {offsets = [0, 128], sizes = [8, 128], strides = [1, 1]} : vector<8x384xf32> to vector<8x128xf32>
    %92 = vector.extract_strided_slice %89 {offsets = [0, 256], sizes = [8, 128], strides = [1, 1]} : vector<8x384xf32> to vector<8x128xf32>
    %93 = vector.extract_strided_slice %83 {offsets = [0, 384], sizes = [8, 128], strides = [1, 1]} : vector<8x512xf32> to vector<8x128xf32>
    %94 = math.tanh %93 : vector<8x128xf32>
    %95 = arith.mulf %91, %76 : vector<8x128xf32>
    %96 = arith.mulf %90, %94 : vector<8x128xf32>
    %97 = arith.addf %95, %96 : vector<8x128xf32>
    %98 = math.tanh %97 : vector<8x128xf32>
    %99 = arith.mulf %92, %98 : vector<8x128xf32>
    %c24_34 = arith.constant 24 : index
    %c0_35 = arith.constant 0 : index
    %100 = vector.load %arg8[%c24_34, %c0_35] : memref<64x128xf32, #tpu.memory_space<vmem>>, vector<8x128xf32>
    tpu.vector_store %arg8[%c24_34, %c0_35], %99 {strides = array<i32>} : memref<64x128xf32, #tpu.memory_space<vmem>>, vector<8x128xf32>,
    %c32 = arith.constant 32 : index
    %c0_36 = arith.constant 0 : index
    %101 = vector.load %arg9[%c32, %c0_36] : memref<64x512xf32, #tpu.memory_space<vmem>>, vector<8x512xf32>
    %102 = arith.truncf %99 : vector<8x128xf32> to vector<8x128xbf16>
    %cst_37 = arith.constant dense<0.000000e+00> : vector<8x512xf32>
    %103 = tpu.matmul %102, %6, %cst_37 {dimension_numbers = #tpu.dot_dimension_numbers<[1], [0], [0], [1], [0, 0, 1, 1], [], []>} : vector<8x128xbf16>, vector<128x512xbf16>, vector<8x512xf32> -> vector<8x512xf32>
    %104 = arith.addf %101, %103 : vector<8x512xf32>
    %105 = vector.extract_strided_slice %104 {offsets = [0, 0], sizes = [8, 384], strides = [1, 1]} : vector<8x512xf32> to vector<8x384xf32>
    %106 = arith.negf %105 : vector<8x384xf32>
    %107 = math.exp %106 : vector<8x384xf32>
    %cst_38 = arith.constant 1.000000e+00 : f32
    %108 = vector.broadcast %cst_38 : f32 to vector<8x384xf32>
    %109 = arith.addf %108, %107 : vector<8x384xf32>
    %110 = arith.divf %108, %109 : vector<8x384xf32>
    %111 = vector.extract_strided_slice %110 {offsets = [0, 0], sizes = [8, 128], strides = [1, 1]} : vector<8x384xf32> to vector<8x128xf32>
    %112 = vector.extract_strided_slice %110 {offsets = [0, 128], sizes = [8, 128], strides = [1, 1]} : vector<8x384xf32> to vector<8x128xf32>
    %113 = vector.extract_strided_slice %110 {offsets = [0, 256], sizes = [8, 128], strides = [1, 1]} : vector<8x384xf32> to vector<8x128xf32>
    %114 = vector.extract_strided_slice %104 {offsets = [0, 384], sizes = [8, 128], strides = [1, 1]} : vector<8x512xf32> to vector<8x128xf32>
    %115 = math.tanh %114 : vector<8x128xf32>
    %116 = arith.mulf %112, %97 : vector<8x128xf32>
    %117 = arith.mulf %111, %115 : vector<8x128xf32>
    %118 = arith.addf %116, %117 : vector<8x128xf32>
    %119 = math.tanh %118 : vector<8x128xf32>
    %120 = arith.mulf %113, %119 : vector<8x128xf32>
    %c32_39 = arith.constant 32 : index
    %c0_40 = arith.constant 0 : index
    %121 = vector.load %arg8[%c32_39, %c0_40] : memref<64x128xf32, #tpu.memory_space<vmem>>, vector<8x128xf32>
    tpu.vector_store %arg8[%c32_39, %c0_40], %120 {strides = array<i32>} : memref<64x128xf32, #tpu.memory_space<vmem>>, vector<8x128xf32>,
    %c40 = arith.constant 40 : index
    %c0_41 = arith.constant 0 : index
    %122 = vector.load %arg9[%c40, %c0_41] : memref<64x512xf32, #tpu.memory_space<vmem>>, vector<8x512xf32>
    %123 = arith.truncf %120 : vector<8x128xf32> to vector<8x128xbf16>
    %cst_42 = arith.constant dense<0.000000e+00> : vector<8x512xf32>
    %124 = tpu.matmul %123, %6, %cst_42 {dimension_numbers = #tpu.dot_dimension_numbers<[1], [0], [0], [1], [0, 0, 1, 1], [], []>} : vector<8x128xbf16>, vector<128x512xbf16>, vector<8x512xf32> -> vector<8x512xf32>
    %125 = arith.addf %122, %124 : vector<8x512xf32>
    %126 = vector.extract_strided_slice %125 {offsets = [0, 0], sizes = [8, 384], strides = [1, 1]} : vector<8x512xf32> to vector<8x384xf32>
    %127 = arith.negf %126 : vector<8x384xf32>
    %128 = math.exp %127 : vector<8x384xf32>
    %cst_43 = arith.constant 1.000000e+00 : f32
    %129 = vector.broadcast %cst_43 : f32 to vector<8x384xf32>
    %130 = arith.addf %129, %128 : vector<8x384xf32>
    %131 = arith.divf %129, %130 : vector<8x384xf32>
    %132 = vector.extract_strided_slice %131 {offsets = [0, 0], sizes = [8, 128], strides = [1, 1]} : vector<8x384xf32> to vector<8x128xf32>
    %133 = vector.extract_strided_slice %131 {offsets = [0, 128], sizes = [8, 128], strides = [1, 1]} : vector<8x384xf32> to vector<8x128xf32>
    %134 = vector.extract_strided_slice %131 {offsets = [0, 256], sizes = [8, 128], strides = [1, 1]} : vector<8x384xf32> to vector<8x128xf32>
    %135 = vector.extract_strided_slice %125 {offsets = [0, 384], sizes = [8, 128], strides = [1, 1]} : vector<8x512xf32> to vector<8x128xf32>
    %136 = math.tanh %135 : vector<8x128xf32>
    %137 = arith.mulf %133, %118 : vector<8x128xf32>
    %138 = arith.mulf %132, %136 : vector<8x128xf32>
    %139 = arith.addf %137, %138 : vector<8x128xf32>
    %140 = math.tanh %139 : vector<8x128xf32>
    %141 = arith.mulf %134, %140 : vector<8x128xf32>
    %c40_44 = arith.constant 40 : index
    %c0_45 = arith.constant 0 : index
    %142 = vector.load %arg8[%c40_44, %c0_45] : memref<64x128xf32, #tpu.memory_space<vmem>>, vector<8x128xf32>
    tpu.vector_store %arg8[%c40_44, %c0_45], %141 {strides = array<i32>} : memref<64x128xf32, #tpu.memory_space<vmem>>, vector<8x128xf32>,
    %c48 = arith.constant 48 : index
    %c0_46 = arith.constant 0 : index
    %143 = vector.load %arg9[%c48, %c0_46] : memref<64x512xf32, #tpu.memory_space<vmem>>, vector<8x512xf32>
    %144 = arith.truncf %141 : vector<8x128xf32> to vector<8x128xbf16>
    %cst_47 = arith.constant dense<0.000000e+00> : vector<8x512xf32>
    %145 = tpu.matmul %144, %6, %cst_47 {dimension_numbers = #tpu.dot_dimension_numbers<[1], [0], [0], [1], [0, 0, 1, 1], [], []>} : vector<8x128xbf16>, vector<128x512xbf16>, vector<8x512xf32> -> vector<8x512xf32>
    %146 = arith.addf %143, %145 : vector<8x512xf32>
    %147 = vector.extract_strided_slice %146 {offsets = [0, 0], sizes = [8, 384], strides = [1, 1]} : vector<8x512xf32> to vector<8x384xf32>
    %148 = arith.negf %147 : vector<8x384xf32>
    %149 = math.exp %148 : vector<8x384xf32>
    %cst_48 = arith.constant 1.000000e+00 : f32
    %150 = vector.broadcast %cst_48 : f32 to vector<8x384xf32>
    %151 = arith.addf %150, %149 : vector<8x384xf32>
    %152 = arith.divf %150, %151 : vector<8x384xf32>
    %153 = vector.extract_strided_slice %152 {offsets = [0, 0], sizes = [8, 128], strides = [1, 1]} : vector<8x384xf32> to vector<8x128xf32>
    %154 = vector.extract_strided_slice %152 {offsets = [0, 128], sizes = [8, 128], strides = [1, 1]} : vector<8x384xf32> to vector<8x128xf32>
    %155 = vector.extract_strided_slice %152 {offsets = [0, 256], sizes = [8, 128], strides = [1, 1]} : vector<8x384xf32> to vector<8x128xf32>
    %156 = vector.extract_strided_slice %146 {offsets = [0, 384], sizes = [8, 128], strides = [1, 1]} : vector<8x512xf32> to vector<8x128xf32>
    %157 = math.tanh %156 : vector<8x128xf32>
    %158 = arith.mulf %154, %139 : vector<8x128xf32>
    %159 = arith.mulf %153, %157 : vector<8x128xf32>
    %160 = arith.addf %158, %159 : vector<8x128xf32>
    %161 = math.tanh %160 : vector<8x128xf32>
    %162 = arith.mulf %155, %161 : vector<8x128xf32>
    %c48_49 = arith.constant 48 : index
    %c0_50 = arith.constant 0 : index
    %163 = vector.load %arg8[%c48_49, %c0_50] : memref<64x128xf32, #tpu.memory_space<vmem>>, vector<8x128xf32>
    tpu.vector_store %arg8[%c48_49, %c0_50], %162 {strides = array<i32>} : memref<64x128xf32, #tpu.memory_space<vmem>>, vector<8x128xf32>,
    %c56 = arith.constant 56 : index
    %c0_51 = arith.constant 0 : index
    %164 = vector.load %arg9[%c56, %c0_51] : memref<64x512xf32, #tpu.memory_space<vmem>>, vector<8x512xf32>
    %165 = arith.truncf %162 : vector<8x128xf32> to vector<8x128xbf16>
    %cst_52 = arith.constant dense<0.000000e+00> : vector<8x512xf32>
    %166 = tpu.matmul %165, %6, %cst_52 {dimension_numbers = #tpu.dot_dimension_numbers<[1], [0], [0], [1], [0, 0, 1, 1], [], []>} : vector<8x128xbf16>, vector<128x512xbf16>, vector<8x512xf32> -> vector<8x512xf32>
    %167 = arith.addf %164, %166 : vector<8x512xf32>
    %168 = vector.extract_strided_slice %167 {offsets = [0, 0], sizes = [8, 384], strides = [1, 1]} : vector<8x512xf32> to vector<8x384xf32>
    %169 = arith.negf %168 : vector<8x384xf32>
    %170 = math.exp %169 : vector<8x384xf32>
    %cst_53 = arith.constant 1.000000e+00 : f32
    %171 = vector.broadcast %cst_53 : f32 to vector<8x384xf32>
    %172 = arith.addf %171, %170 : vector<8x384xf32>
    %173 = arith.divf %171, %172 : vector<8x384xf32>
    %174 = vector.extract_strided_slice %173 {offsets = [0, 0], sizes = [8, 128], strides = [1, 1]} : vector<8x384xf32> to vector<8x128xf32>
    %175 = vector.extract_strided_slice %173 {offsets = [0, 128], sizes = [8, 128], strides = [1, 1]} : vector<8x384xf32> to vector<8x128xf32>
    %176 = vector.extract_strided_slice %173 {offsets = [0, 256], sizes = [8, 128], strides = [1, 1]} : vector<8x384xf32> to vector<8x128xf32>
    %177 = vector.extract_strided_slice %167 {offsets = [0, 384], sizes = [8, 128], strides = [1, 1]} : vector<8x512xf32> to vector<8x128xf32>
    %178 = math.tanh %177 : vector<8x128xf32>
    %179 = arith.mulf %175, %160 : vector<8x128xf32>
    %180 = arith.mulf %174, %178 : vector<8x128xf32>
    %181 = arith.addf %179, %180 : vector<8x128xf32>
    %182 = math.tanh %181 : vector<8x128xf32>
    %183 = arith.mulf %176, %182 : vector<8x128xf32>
    %c56_54 = arith.constant 56 : index
    %c0_55 = arith.constant 0 : index
    %184 = vector.load %arg8[%c56_54, %c0_55] : memref<64x128xf32, #tpu.memory_space<vmem>>, vector<8x128xf32>
    tpu.vector_store %arg8[%c56_54, %c0_55], %183 {strides = array<i32>} : memref<64x128xf32, #tpu.memory_space<vmem>>, vector<8x128xf32>,
    %c2_i32 = arith.constant 2 : i32
    %185 = arith.cmpi eq, %arg0, %c2_i32 : i32
    %186 = arith.extui %185 : i1 to i32
    %c0_i32_56 = arith.constant 0 : i32
    %187 = arith.cmpi ne, %186, %c0_i32_56 : i32
    scf.if %187 {
      %c0_57 = arith.constant 0 : index
      %c0_58 = arith.constant 0 : index
      %188 = vector.load %arg5[%c0_57, %c0_58] : memref<128x1xf32, #tpu.memory_space<vmem>>, vector<128x1xf32>
      %cst_59 = arith.constant dense<0.000000e+00> : vector<8x1xf32>
      %189 = tpu.matmul %183, %188, %cst_59 {dimension_numbers = #tpu.dot_dimension_numbers<[1], [0], [0], [1], [0, 0, 1, 1], [], []>} : vector<8x128xf32>, vector<128x1xf32>, vector<8x1xf32> -> vector<8x1xf32>
      %c0_60 = arith.constant 0 : index
      %190 = memref.load %arg6[%c0_60] : memref<1xf32, #tpu.memory_space<smem>>
      %191 = vector.broadcast %190 : f32 to vector<8x1xf32>
      %192 = arith.addf %189, %191 : vector<8x1xf32>
      %c0_61 = arith.constant 0 : index
      %c0_62 = arith.constant 0 : index
      %193 = vector.load %arg7[%c0_61, %c0_62] : memref<8x1xf32, #tpu.memory_space<vmem>>, vector<8x1xf32>
      tpu.vector_store %arg7[%c0_61, %c0_62], %192 {strides = array<i32>} : memref<8x1xf32, #tpu.memory_space<vmem>>, vector<8x1xf32>,
    } else {
    }
    return
  }
  func.func @transform_0(%arg0: i32) -> (i32, i32) {
    %c0_i32 = arith.constant 0 : i32
    %c0_i32_0 = arith.constant 0 : i32
    %c0_i32_1 = arith.constant 0 : i32
    return %c0_i32, %c0_i32_0 : i32, i32
  }
  func.func @transform_1(%arg0: i32) -> (i32, i32, i32) {
    %c0_i32 = arith.constant 0 : i32
    %c0_i32_0 = arith.constant 0 : i32
    %c0_i32_1 = arith.constant 0 : i32
    return %arg0, %c0_i32, %c0_i32_0 : i32, i32, i32
  }
  func.func @transform_2(%arg0: i32) -> (i32, i32, i32) {
    %c0_i32 = arith.constant 0 : i32
    %c0_i32_0 = arith.constant 0 : i32
    %c0_i32_1 = arith.constant 0 : i32
    return %arg0, %c0_i32, %c0_i32_0 : i32, i32, i32
  }
  func.func @transform_3(%arg0: i32) -> (i32, i32, i32) {
    %c0_i32 = arith.constant 0 : i32
    %c0_i32_0 = arith.constant 0 : i32
    %c0_i32_1 = arith.constant 0 : i32
    return %arg0, %c0_i32, %c0_i32_0 : i32, i32, i32
  }
  func.func @transform_4(%arg0: i32) -> (i32, i32) {
    %c0_i32 = arith.constant 0 : i32
    %c0_i32_0 = arith.constant 0 : i32
    %c0_i32_1 = arith.constant 0 : i32
    return %c0_i32, %c0_i32_0 : i32, i32
  }
  func.func @transform_5(%arg0: i32) -> i32 {
    %c0_i32 = arith.constant 0 : i32
    %c0_i32_0 = arith.constant 0 : i32
    return %c0_i32 : i32
  }
  func.func @transform_6(%arg0: i32) -> (i32, i32) {
    %c0_i32 = arith.constant 0 : i32
    %c0_i32_0 = arith.constant 0 : i32
    %c0_i32_1 = arith.constant 0 : i32
    return %c0_i32, %c0_i32_0 : i32, i32
  }
}

</mosaic_0001>

<bundles_post_ra>
// kernel: tpu_custom_call.1
= control target key start
LH: loop header
LB: loop body
LE: loop exit
PB: predicated region body
PF: predicated region fallthrough
CT: control target
= control target key end

     0   :  { %s3482_s0 = inlined_call_operand.vmem [shape: f32[64,128], index: 0, kind: input, shape index: {}]   ;;  %s3483_s1 = inlined_call_operand.hbm [shape: bf16[3,128,512], index: 1, kind: input, shape index: {}]   ;;  %s3484_s2 = inlined_call_operand.hbm [shape: bf16[3,128,512], index: 2, kind: input, shape index: {}]   ;;  %s3485_s3 = inlined_call_operand.vmem [shape: f32[3,1,512], index: 3, kind: input, shape index: {}]   ;;  %s3486_s4 = inlined_call_operand.vmem [shape: f32[128,1], index: 4, kind: input, shape index: {}]   ;;  %s3487_s5 = inlined_call_operand.<no memory space> [shape: f32[1], index: 5, kind: input, shape index: {}]   ;;  %s3488_s6 = inlined_call_operand.vmem [shape: f32[8,1], index: 6, kind: output, shape index: {}]  }
   0x1   :  { %11 = sst [smem:[#allocation4]] %s3487_s5 }
   0x2   :  { %12 = vsyncpa [#allocation6], 0 }
   0x3   :  { %14 = vsyncpa [#allocation6 + $0x1], 0 }
   0x4   :  { %15 = vsyncpa [#allocation8], 0 }
   0x5   :  { %17 = vsyncpa [#allocation8 + $0x1], 0  ;;  %s2690_s23 = smov 0   ;;  %s2692_s24 = smov 0  }
   0x6   :  { %s2694_s25 = smov 0   ;;  %s2696_s26 = smov 0  }
   0x7 LB: > { %s2709_s5 = sadd.s32 4294967295, %s2647_s26   ;;  %s2712_s27 = sadd.s32 1, %s2647_s26   ;;  %s2647_s26 = sphi %s2696_s26, %s3540_s26   ;;  %s2643_s25 = sphi %s2694_s25, %s3539_s25   ;;  %s2639_s24 = sphi %s2692_s24, %s3538_s24   ;;  %s2635_s23 = sphi %s2690_s23, %s3537_s23  }
   0x8   : > { %s48_s28 = ssub.s32 %s2647_s26, %s2712_s27  ;;  %s51_s29 = sadd.s32 1, %s2643_s25 }
   0x9   : > { %p49_p0 = scmp.eq.s32.totalorder %s48_s28, 0  ;;  %p58_p1 = scmp.ne.s32.totalorder %s2643_s25, %s2639_s24 }
   0xa   : > { %p59_p2 = scmp.eq.s32.totalorder %s2647_s26, 0  ;;  %p64_p3 = scmp.ne.s32.totalorder %s2639_s24, %s2635_s23 }
   0xb   : > { %s2722_s30 = scalar_select %p49_p0, %s2643_s25, %s51_s29  }
   0xc   : > { %p2724_p4 = por %p59_p2, %p58_p1  ;;  %p65_p5 = scmp.eq.s32.totalorder %s2709_s5, 0 }
   0xd   : > { %p2385_p6 = scmp.lt.s32.totalorder %s2647_s26, 3  ;;  %s2735_s9 = sand.u32 1, %s2643_s25  }
   0xe   : > { %p2730_p7 = por %p65_p5, %p64_p3  ;;  %s2014_s10 = sshll.u32 %s2735_s9, 8 }
   0xf   : > { %s2308_s11 = sshll.u32 %s2647_s26, 8  ;;  %s216_s15 = scalar_lea.vmem [#allocation5], %s2014_s10 }
  0x10   : > { %s221_s14 = scalar_lea.hbm %s3483_s1, %s2308_s11  ;;  %s224_s16 = sshll.u32 %s216_s15, 4  ;;  %s225_s16 = int_to_ptr.vmem [resolvable:$true] %s224_s16 }
  0x11   : > { %s222_s17 = sshll.u32 %s221_s14, 4  ;;  %p2748_p8 = pnand %p2385_p6, %p2724_p4  ;;  %s223_s17 = int_to_ptr.hbm [resolvable:$true] %s222_s17 }
  0x12   : > { %p2020_p9 = scmp.ge.s32.totalorder %s2647_s26, 1  ;;  %s213_s19 = scalar_lea.sflag [#allocation6], %s2735_s9 }
  0x13   : > { %s2549_s20 = sshra.s32 %s223_s17, 4  ;;  %p2553_p11 = pneg %p2748_p8  ;;  %s2550_s20 = int_to_ptr.hbm [resolvable:$true] %s2549_s20 }
  0x14   : > { %s2551_s21 = scalar_lea.hbm %s2550_s20, 256  ;;  %s2556_s28 = scalar_lea.hbm %s3483_s1, 768 }
  0x15   : > { %p2552_p10 = scmp.ne.s32.totalorder %s2550_s20, %s2551_s21  ;;  %p2557_p0 = scmp.lt.s32.totalorder %s2550_s20, %s3483_s1 }
  0x16   : > { %p2558_p1 = scmp.lt.s32.totalorder %s2556_s28, %s2551_s21 }
  0x17   : > { %p2554_p12 = pnand %p2553_p11, %p2552_p10 }
  0x18   : > { %p2559_p2 = por %p2558_p1, %p2557_p0 }
  0x19   : > { %p2555_p13 = pneg %p2554_p12 }
  0x1b   : > { %p2560_p3 = pnand %p2559_p2, %p2555_p13 }
  0x1d   : > { %2563 = shalt.err (!%p2560_p3)
}
  0x1e   : > { %s2649_s12 = smov 256   ;;  %s2650_s13 = smov 16  }
  0x1f   : > { %2381 = dma.hbm_to_vmem [thread:$0]  (!%p2748_p8), %s223_s17, 4096, %s225_s16, %s213_s19, %s2649_s12, %s2649_s12, %s2650_s13  }
  0x20   : > { %p261_p4 = scmp.lt.s32.totalorder %s2647_s26, 4  ;;  %s243_s20 = scalar_lea.hbm %s3484_s2, %s2308_s11 }
  0x21   : > { %s244_s22 = sshll.u32 %s243_s20, 4  ;;  %s238_s23 = scalar_lea.vmem [#allocation7], %s2014_s10  ;;  %s245_s22 = int_to_ptr.hbm [resolvable:$true] %s244_s22 }
  0x22   : > { %p2775_p5 = pnand %p2020_p9, %p261_p4  ;;  %s246_s28 = sshll.u32 %s238_s23, 4  ;;  %s247_s28 = int_to_ptr.vmem [resolvable:$true] %s246_s28 }
  0x23   : > { %s235_s29 = scalar_lea.sflag [#allocation8], %s2735_s9  ;;  %s2579_s7 = sshra.s32 %s245_s22, 4  ;;  %s2580_s7 = int_to_ptr.hbm [resolvable:$true] %s2579_s7 }
  0x24   : > { %s2581_s16 = scalar_lea.hbm %s2580_s7, 256  ;;  %s2586_s17 = scalar_lea.hbm %s3484_s2, 768 }
  0x25   : > { %p2582_p6 = scmp.ne.s32.totalorder %s2580_s7, %s2581_s16  ;;  %p2587_p9 = scmp.lt.s32.totalorder %s2580_s7, %s3484_s2 }
  0x26   : > { %p2588_p13 = scmp.lt.s32.totalorder %s2586_s17, %s2581_s16 }
  0x27   : > { %p2584_p10 = pnand %p2582_p6, %p2553_p11 }
  0x28   : > { %p2589_p0 = por %p2588_p13, %p2587_p9 }
  0x29   : > { %p2585_p12 = pneg %p2584_p10 }
  0x2b   : > { %p2590_p1 = pnand %p2589_p0, %p2585_p12 }
  0x2d   : > { %2593 = shalt.err (!%p2590_p1)
}
  0x2e   : > { %2384 = dma.hbm_to_vmem [thread:$0]  (!%p2748_p8), %s245_s22, 4096, %s247_s28, %s235_s29, %s2649_s12, %s2649_s12, %s2650_s13  }
  0x2f   : > { %265 = sbr.rel (%p2775_p5) target bundleno = 1709 (0x6ad), region = 44 }
  0x34   : > { %s267_s9 = sand.u32 1, %s2639_s24  }
  0x35   : > { %s2021_s10 = sshll.u32 %s267_s9, 8  ;;  %s268_s15 = scalar_lea.sflag [#allocation6], %s267_s9 }
  0x36   : > { %s2796_s20 = scalar_lea.vmem [#allocation5], %s2021_s10 }
  0x37   : > { %2626 = dma.done.wait (%p2730_p7), %s268_s15, 4096  }
  0x38   : > { %2628 = vsyncadd (%p2730_p7), %s268_s15, 4294963200  ;;  %s278_s23 = scalar_lea.sflag [#allocation8], %s267_s9  ;;  %s2802_s7 = scalar_lea.vmem [#allocation7], %s2021_s10 }
  0x39   : > { %2630 = dma.done.wait (%p2730_p7), %s278_s23, 4096  }
  0x3a   : > { %2632 = vsyncadd (%p2730_p7), %s278_s23, 4294963200  ;;  %p315_p8 = scmp.lt.s32.totalorder %s2709_s5, 2  ;;  %p2024_p11 = scmp.ne.s32.totalorder %s2709_s5, 0 }
  0x3c   : > { %s316_s18 = scalar_select %p315_p8, %s2709_s5, 2 }
  0x3d   : > { %323 = sbr.rel (%p2024_p11) target bundleno = 75 (0x4b), region = 56 }
  0x3e   : > { %s2023_s12 = sshll.u32 %s316_s18, 2 }
  0x3f   : > { %s2813_s22 = scalar_lea.vmem %s3485_s3, %s2023_s12 }
  0x42   : > { %v324_v0 = vld [vmem:[%s3482_s0] sm:$0xff]  ;;  %v325_v1 = vld [vmem:[%s3482_s0 + $0x8] sm:$0xff]  ;;  %v326_v2 = vld [vmem:[%s3482_s0 + $0x10] sm:$0xff] }
  0x43   : > { %332 = vst [vmem:[#allocation2 + $0x30] sm:$0xff] %v324_v0  ;;  %v327_v3 = vld [vmem:[%s3482_s0 + $0x18] sm:$0xff]  ;;  %v328_v4 = vld [vmem:[%s3482_s0 + $0x20] sm:$0xff]  ;;  %v329_v5 = vld [vmem:[%s3482_s0 + $0x28] sm:$0xff] }
  0x44   : > { %333 = vst [vmem:[#allocation2] sm:$0xff] %v325_v1  ;;  %v330_v6 = vld [vmem:[%s3482_s0 + $0x30] sm:$0xff]  ;;  %v331_v7 = vld [vmem:[%s3482_s0 + $0x38] sm:$0xff] }
  0x45   : > { %334 = vst [vmem:[#allocation2 + $0x18] sm:$0xff] %v326_v2 }
  0x46   : > { %335 = vst [vmem:[#allocation2 + $0x10] sm:$0xff] %v327_v3 }
  0x47   : > { %336 = vst [vmem:[#allocation2 + $0x8] sm:$0xff] %v328_v4 }
  0x48   : > { %337 = vst [vmem:[#allocation2 + $0x20] sm:$0xff] %v329_v5 }
  0x49   : > { %338 = vst [vmem:[#allocation2 + $0x28] sm:$0xff] %v330_v6 }
  0x4a   : > { %339 = vst [vmem:[#allocation2 + $0x38] sm:$0xff] %v331_v7 }
  0x4b PF: > { %v2139_v8 = vld [vmem:[%s2796_s20 + $0xe0] sm:$0xf]  ;;  %v2340_v9 = vld [vmem:[%s2796_s20 + $0xec] sm:$0xf0]  ;;  %v2338_v10 = vld [vmem:[%s2796_s20 + $0xe4] sm:$0xf] }
  0x4c   : > { %v2140_v11 = vor.u32 %v2340_v9, %v2139_v8  ;;  %v2141_v12 = vld [vmem:[%s2796_s20 + $0xf0] sm:$0xf0]  ;;  %v2147_v13 = vld [vmem:[%s2796_s20 + $0xe8] sm:$0xf]  ;;  %v2341_v14 = vld [vmem:[%s2796_s20 + $0xf4] sm:$0xf0] }
  0x4d   : > { %v2144_v15 = vor.u32 %v2338_v10, %v2141_v12  ;;  %v2148_v16 = vor.u32 %v2341_v14, %v2147_v13  ;;  %v2339_v17 = vld [vmem:[%s2796_s20 + $0xec] sm:$0xf]  ;;  %v2149_v18 = vld [vmem:[%s2796_s20 + $0xf8] sm:$0xf0]  ;;  %v2123_v19 = vld [vmem:[%s2796_s20 + $0xc0] sm:$0xf] }
  0x4e   : > { %586 = vmatpush.bf16.msra.mxu0 %v2140_v11  ;;  %v2152_v20 = vor.u32 %v2339_v17, %v2149_v18  ;;  %v2336_v21 = vld [vmem:[%s2796_s20 + $0xcc] sm:$0xf0]  ;;  %v2334_v22 = vld [vmem:[%s2796_s20 + $0xc4] sm:$0xf]  ;;  %v2125_v23 = vld [vmem:[%s2796_s20 + $0xd0] sm:$0xf0] }
  0x4f   : > { %615 = vmatpush.bf16.msra.mxu1 %v2144_v15  ;;  %644 = vmatpush.bf16.msra.mxu2 %v2148_v16  ;;  %v2124_v24 = vor.u32 %v2336_v21, %v2123_v19  ;;  %v2128_v25 = vor.u32 %v2334_v22, %v2125_v23  ;;  %v2131_v26 = vld [vmem:[%s2796_s20 + $0xc8] sm:$0xf]  ;;  %v2337_v27 = vld [vmem:[%s2796_s20 + $0xd4] sm:$0xf0]  ;;  %v2335_v28 = vld [vmem:[%s2796_s20 + $0xcc] sm:$0xf] }
  0x50   : > { %673 = vmatpush.bf16.msra.mxu3 %v2152_v20  ;;  %v2132_v29 = vor.u32 %v2337_v27, %v2131_v26  ;;  %v2133_v30 = vld [vmem:[%s2796_s20 + $0xd8] sm:$0xf0]  ;;  %v2107_v31 = vld [vmem:[%s2796_s20 + $0xa0] sm:$0xf]  ;;  %v2332_v32 = vld [vmem:[%s2796_s20 + $0xac] sm:$0xf0] }
  0x51   : > { %v2136_v33 = vor.u32 %v2335_v28, %v2133_v30  ;;  %v2330_v34 = vld [vmem:[%s2796_s20 + $0xa4] sm:$0xf]  ;;  %v2109_v35 = vld [vmem:[%s2796_s20 + $0xb0] sm:$0xf0]  ;;  %v2115_v36 = vld [vmem:[%s2796_s20 + $0xa8] sm:$0xf]  ;;  %v2108_v37 = vor.u32 %v2332_v32, %v2107_v31 }
  0x52   : > { %587 = vmatpush.bf16.msra.mxu0 %v2124_v24  ;;  %v2333_v38 = vld [vmem:[%s2796_s20 + $0xb4] sm:$0xf0]  ;;  %v2331_v39 = vld [vmem:[%s2796_s20 + $0xac] sm:$0xf]  ;;  %v2117_v40 = vld [vmem:[%s2796_s20 + $0xb8] sm:$0xf0]  ;;  %v2112_v41 = vor.u32 %v2330_v34, %v2109_v35 }
  0x53   : > { %616 = vmatpush.bf16.msra.mxu1 %v2128_v25  ;;  %645 = vmatpush.bf16.msra.mxu2 %v2132_v29  ;;  %v2116_v42 = vor.u32 %v2333_v38, %v2115_v36  ;;  %v2091_v43 = vld [vmem:[%s2796_s20 + $0x80] sm:$0xf]  ;;  %v2328_v44 = vld [vmem:[%s2796_s20 + $0x8c] sm:$0xf0]  ;;  %v2326_v45 = vld [vmem:[%s2796_s20 + $0x84] sm:$0xf]  ;;  %v2120_v46 = vor.u32 %v2331_v39, %v2117_v40 }
  0x54   : > { %674 = vmatpush.bf16.msra.mxu3 %v2136_v33  ;;  %v2093_v47 = vld [vmem:[%s2796_s20 + $0x90] sm:$0xf0]  ;;  %v2099_v48 = vld [vmem:[%s2796_s20 + $0x88] sm:$0xf]  ;;  %v2329_v49 = vld [vmem:[%s2796_s20 + $0x94] sm:$0xf0]  ;;  %v2092_v52 = vor.u32 %v2328_v44, %v2091_v43 }
  0x55   : > { %v2327_v50 = vld [vmem:[%s2796_s20 + $0x8c] sm:$0xf]  ;;  %v2101_v51 = vld [vmem:[%s2796_s20 + $0x98] sm:$0xf0]  ;;  %v2096_v53 = vor.u32 %v2326_v45, %v2093_v47  ;;  %v2100_v54 = vor.u32 %v2329_v49, %v2099_v48  ;;  %v2075_v55 = vld [vmem:[%s2796_s20 + $0x60] sm:$0xf] }
  0x56   : > { %588 = vmatpush.bf16.msra.mxu0 %v2108_v37  ;;  %v2324_v56 = vld [vmem:[%s2796_s20 + $0x6c] sm:$0xf0]  ;;  %v2322_v57 = vld [vmem:[%s2796_s20 + $0x64] sm:$0xf]  ;;  %v2104_v58 = vor.u32 %v2327_v50, %v2101_v51  ;;  %v2077_v59 = vld [vmem:[%s2796_s20 + $0x70] sm:$0xf0] }
  0x57   : > { %617 = vmatpush.bf16.msra.mxu1 %v2112_v41  ;;  %646 = vmatpush.bf16.msra.mxu2 %v2116_v42  ;;  %v2083_v60 = vld [vmem:[%s2796_s20 + $0x68] sm:$0xf]  ;;  %v2325_v61 = vld [vmem:[%s2796_s20 + $0x74] sm:$0xf0]  ;;  %v2323_v62 = vld [vmem:[%s2796_s20 + $0x6c] sm:$0xf]  ;;  %v2076_v0 = vor.u32 %v2324_v56, %v2075_v55  ;;  %v2080_v1 = vor.u32 %v2322_v57, %v2077_v59 }
  0x58   : > { %675 = vmatpush.bf16.msra.mxu3 %v2120_v46  ;;  %v2085_v63 = vld [vmem:[%s2796_s20 + $0x78] sm:$0xf0]  ;;  %v2084_v2 = vor.u32 %v2325_v61, %v2083_v60  ;;  %v2059_v3 = vld [vmem:[%s2796_s20 + $0x40] sm:$0xf]  ;;  %v2320_v4 = vld [vmem:[%s2796_s20 + $0x4c] sm:$0xf0] }
  0x59   : > { %v2318_v5 = vld [vmem:[%s2796_s20 + $0x44] sm:$0xf]  ;;  %v2088_v6 = vor.u32 %v2323_v62, %v2085_v63  ;;  %v2061_v7 = vld [vmem:[%s2796_s20 + $0x50] sm:$0xf0]  ;;  %v2067_v8 = vld [vmem:[%s2796_s20 + $0x48] sm:$0xf]  ;;  %v2060_v12 = vor.u32 %v2320_v4, %v2059_v3 }
  0x5a   : > { %589 = vmatpush.bf16.msra.mxu0 %v2092_v52  ;;  %v2321_v9 = vld [vmem:[%s2796_s20 + $0x54] sm:$0xf0]  ;;  %v2319_v10 = vld [vmem:[%s2796_s20 + $0x4c] sm:$0xf]  ;;  %v2069_v11 = vld [vmem:[%s2796_s20 + $0x58] sm:$0xf0]  ;;  %v2064_v13 = vor.u32 %v2318_v5, %v2061_v7 }
  0x5b   : > { %618 = vmatpush.bf16.msra.mxu1 %v2096_v53  ;;  %647 = vmatpush.bf16.msra.mxu2 %v2100_v54  ;;  %v2068_v14 = vor.u32 %v2321_v9, %v2067_v8  ;;  %v2043_v15 = vld [vmem:[%s2796_s20 + $0x20] sm:$0xf]  ;;  %v2316_v16 = vld [vmem:[%s2796_s20 + $0x2c] sm:$0xf0]  ;;  %v2314_v17 = vld [vmem:[%s2796_s20 + $0x24] sm:$0xf]  ;;  %v2072_v18 = vor.u32 %v2319_v10, %v2069_v11 }
  0x5c   : > { %676 = vmatpush.bf16.msra.mxu3 %v2104_v58  ;;  %v2045_v19 = vld [vmem:[%s2796_s20 + $0x30] sm:$0xf0]  ;;  %v2051_v20 = vld [vmem:[%s2796_s20 + $0x28] sm:$0xf]  ;;  %v2317_v21 = vld [vmem:[%s2796_s20 + $0x34] sm:$0xf0]  ;;  %v2044_v24 = vor.u32 %v2316_v16, %v2043_v15 }
  0x5d   : > { %v2315_v22 = vld [vmem:[%s2796_s20 + $0x2c] sm:$0xf]  ;;  %v2053_v23 = vld [vmem:[%s2796_s20 + $0x38] sm:$0xf0]  ;;  %v2027_v25 = vld [vmem:[%s2796_s20] sm:$0xf]  ;;  %v2048_v27 = vor.u32 %v2314_v17, %v2045_v19  ;;  %v2052_v28 = vor.u32 %v2317_v21, %v2051_v20 }
  0x5e   : > { %590 = vmatpush.bf16.msra.mxu0 %v2076_v0  ;;  %v2312_v26 = vld [vmem:[%s2796_s20 + $0xc] sm:$0xf0]  ;;  %v2310_v29 = vld [vmem:[%s2796_s20 + $0x4] sm:$0xf]  ;;  %v2029_v30 = vld [vmem:[%s2796_s20 + $0x10] sm:$0xf0]  ;;  %v2056_v32 = vor.u32 %v2315_v22, %v2053_v23 }
  0x5f   : > { %619 = vmatpush.bf16.msra.mxu1 %v2080_v1  ;;  %648 = vmatpush.bf16.msra.mxu2 %v2084_v2  ;;  %v2035_v31 = vld [vmem:[%s2796_s20 + $0x8] sm:$0xf]  ;;  %v2313_v33 = vld [vmem:[%s2796_s20 + $0x14] sm:$0xf0]  ;;  %v2311_v34 = vld [vmem:[%s2796_s20 + $0xc] sm:$0xf]  ;;  %v2028_v39 = vor.u32 %v2312_v26, %v2027_v25  ;;  %v2032_v43 = vor.u32 %v2310_v29, %v2029_v30 }
  0x60   : > { %677 = vmatpush.bf16.msra.mxu3 %v2088_v6  ;;  %v2037_v35 = vld [vmem:[%s2796_s20 + $0x18] sm:$0xf0]  ;;  %v405_v36 = vld [vmem:[#allocation2 + $0x30] sm:$0xff]  ;;  %v2267_v37 = vld [vmem:[%s2802_s7 + $0xe0] sm:$0xf]  ;;  %v2036_v44 = vor.u32 %v2313_v33, %v2035_v31  ;;  %p2305_p7 = scmp.ne.s32.totalorder %s2709_s5, 2 }
  0x61   : > { %v2372_v38 = vld [vmem:[%s2802_s7 + $0xec] sm:$0xf0]  ;;  %v406_v40 = vld [vmem:[#allocation2] sm:$0xff]  ;;  %v2269_v42 = vld [vmem:[%s2802_s7 + $0xf0] sm:$0xf0]  ;;  %v2040_v45 = vor.u32 %v2311_v34, %v2037_v35  ;;  %s1913_s17 = sld [smem:[#allocation4]] (!%p2305_p7) }
  0x62   : > { %591 = vmatpush.bf16.msra.mxu0 %v2060_v12  ;;  %v2370_v41 = vld [vmem:[%s2802_s7 + $0xe4] sm:$0xf]  ;;  %v2908_v46 = vor.u32 %v2372_v38, %v2267_v37  ;;  %v2275_v47 = vld [vmem:[%s2802_s7 + $0xe8] sm:$0xf]  ;;  %v2373_v48 = vld [vmem:[%s2802_s7 + $0xf4] sm:$0xf0]  ;;  %v413_v50 = vpack.c.bf16 %v406_v40, %v405_v36 }
  0x63   : > { %620 = vmatpush.bf16.msra.mxu1 %v2064_v13  ;;  %649 = vmatpush.bf16.msra.mxu2 %v2068_v14  ;;  %v2251_v49 = vld [vmem:[%s2802_s7 + $0xc0] sm:$0xf]  ;;  %v2913_v51 = vor.u32 %v2370_v41, %v2269_v42  ;;  %v2368_v52 = vld [vmem:[%s2802_s7 + $0xcc] sm:$0xf0]  ;;  %v2371_v53 = vld [vmem:[%s2802_s7 + $0xec] sm:$0xf]  ;;  %v2920_v57 = vor.u32 %v2373_v48, %v2275_v47 }
  0x64   : > { %678 = vmatpush.bf16.msra.mxu3 %v2072_v18  ;;  %v2277_v54 = vld [vmem:[%s2802_s7 + $0xf8] sm:$0xf0]  ;;  %v2366_v55 = vld [vmem:[%s2802_s7 + $0xc4] sm:$0xf]  ;;  %v2253_v56 = vld [vmem:[%s2802_s7 + $0xd0] sm:$0xf0]  ;;  %v2923_v58 = vor.u32 %v2368_v52, %v2251_v49 }
  0x65   : > { %v2259_v59 = vld [vmem:[%s2802_s7 + $0xc8] sm:$0xf]  ;;  %v2369_v60 = vld [vmem:[%s2802_s7 + $0xd4] sm:$0xf0]  ;;  %v2927_v61 = vor.u32 %v2371_v53, %v2277_v54  ;;  %v2235_v62 = vld [vmem:[%s2802_s7 + $0xa0] sm:$0xf]  ;;  %v2931_v63 = vor.u32 %v2366_v55, %v2253_v56 }
  0x66   : > { %592 = vmatpush.bf16.msra.mxu0 %v2044_v24  ;;  %v2364_v0 = vld [vmem:[%s2802_s7 + $0xac] sm:$0xf0]  ;;  %v2367_v1 = vld [vmem:[%s2802_s7 + $0xcc] sm:$0xf]  ;;  %v2261_v2 = vld [vmem:[%s2802_s7 + $0xd8] sm:$0xf0]  ;;  %v2939_v5 = vor.u32 %v2369_v60, %v2259_v59 }
  0x67   : > { %621 = vmatpush.bf16.msra.mxu1 %v2048_v27  ;;  %650 = vmatpush.bf16.msra.mxu2 %v2052_v28  ;;  %v2362_v3 = vld [vmem:[%s2802_s7 + $0xa4] sm:$0xf]  ;;  %v2237_v4 = vld [vmem:[%s2802_s7 + $0xb0] sm:$0xf0]  ;;  %v2943_v6 = vor.u32 %v2364_v0, %v2235_v62  ;;  %v2243_v7 = vld [vmem:[%s2802_s7 + $0xa8] sm:$0xf]  ;;  %v2947_v9 = vor.u32 %v2367_v1, %v2261_v2 }
  0x68   : > { %679 = vmatpush.bf16.msra.mxu3 %v2056_v32  ;;  %v2365_v8 = vld [vmem:[%s2802_s7 + $0xb4] sm:$0xf0]  ;;  %v2219_v10 = vld [vmem:[%s2802_s7 + $0x80] sm:$0xf]  ;;  %v2951_v11 = vor.u32 %v2362_v3, %v2237_v4  ;;  %v2360_v12 = vld [vmem:[%s2802_s7 + $0x8c] sm:$0xf0] }
  0x69   : > { %v2363_v13 = vld [vmem:[%s2802_s7 + $0xac] sm:$0xf]  ;;  %v2245_v14 = vld [vmem:[%s2802_s7 + $0xb8] sm:$0xf0]  ;;  %v2358_v15 = vld [vmem:[%s2802_s7 + $0x84] sm:$0xf]  ;;  %v2959_v17 = vor.u32 %v2365_v8, %v2243_v7  ;;  %v2963_v19 = vor.u32 %v2360_v12, %v2219_v10 }
  0x6a   : > { %593 = vmatpush.bf16.msra.mxu0 %v2028_v39  ;;  %v2221_v16 = vld [vmem:[%s2802_s7 + $0x90] sm:$0xf0]  ;;  %v407_v18 = vld [vmem:[#allocation2 + $0x18] sm:$0xff]  ;;  %v2227_v20 = vld [vmem:[%s2802_s7 + $0x88] sm:$0xf]  ;;  %v2967_v22 = vor.u32 %v2363_v13, %v2245_v14 }
  0x6b   : > { %622 = vmatpush.bf16.msra.mxu1 %v2032_v43  ;;  %651 = vmatpush.bf16.msra.mxu2 %v2036_v44  ;;  %v2361_v21 = vld [vmem:[%s2802_s7 + $0x94] sm:$0xf0]  ;;  %v2203_v23 = vld [vmem:[%s2802_s7 + $0x60] sm:$0xf]  ;;  %v2971_v24 = vor.u32 %v2358_v15, %v2221_v16  ;;  %v2356_v25 = vld [vmem:[%s2802_s7 + $0x6c] sm:$0xf0] }
  0x6c   : > { %680 = vmatpush.bf16.msra.mxu3 %v2040_v45  ;;  %v2359_v26 = vld [vmem:[%s2802_s7 + $0x8c] sm:$0xf]  ;;  %v2229_v27 = vld [vmem:[%s2802_s7 + $0x98] sm:$0xf0]  ;;  %v408_v28 = vld [vmem:[#allocation2 + $0x10] sm:$0xff]  ;;  %v2979_v31 = vor.u32 %v2361_v21, %v2227_v20  ;;  %v2983_v32 = vor.u32 %v2356_v25, %v2203_v23 }
  0x6d   : > { %594 = vmatmul.bf16.vlgmr.msra.gmra.mxu0 %v413_v50  ;;  %v2354_v29 = vld [vmem:[%s2802_s7 + $0x64] sm:$0xf]  ;;  %v2205_v30 = vld [vmem:[%s2802_s7 + $0x70] sm:$0xf0]  ;;  %v2211_v33 = vld [vmem:[%s2802_s7 + $0x68] sm:$0xf]  ;;  %v2987_v35 = vor.u32 %v2359_v26, %v2229_v27  ;;  %v414_v37 = vpack.c.bf16 %v408_v28, %v407_v18 }
  0x6e   : > { %898 = vmatpush.bf16.msrb.mxu0 %v2908_v46  ;;  %623 = vmatmul.bf16.vlgmr.msra.gmra.mxu1 %v413_v50  ;;  %v2357_v34 = vld [vmem:[%s2802_s7 + $0x74] sm:$0xf0]  ;;  %v2187_v36 = vld [vmem:[%s2802_s7 + $0x40] sm:$0xf]  ;;  %v2991_v38 = vor.u32 %v2354_v29, %v2205_v30  ;;  %v2352_v39 = vld [vmem:[%s2802_s7 + $0x4c] sm:$0xf0] }
  0x6f   : > { %911 = vmatpush.bf16.msrb.mxu1 %v2913_v51  ;;  %652 = vmatmul.bf16.vlgmr.msra.gmra.mxu2 %v413_v50  ;;  %v2355_v40 = vld [vmem:[%s2802_s7 + $0x6c] sm:$0xf]  ;;  %v2213_v41 = vld [vmem:[%s2802_s7 + $0x78] sm:$0xf0]  ;;  %v2350_v42 = vld [vmem:[%s2802_s7 + $0x44] sm:$0xf]  ;;  %v2999_v44 = vor.u32 %v2357_v34, %v2211_v33  ;;  %v3003_v45 = vor.u32 %v2352_v39, %v2187_v36 }
  0x70   : > { %681 = vmatmul.bf16.vlgmr.msra.gmra.mxu3 %v413_v50  ;;  %924 = vmatpush.bf16.msrb.mxu2 %v2920_v57  ;;  %v2189_v43 = vld [vmem:[%s2802_s7 + $0x50] sm:$0xf0]  ;;  %v2195_v47 = vld [vmem:[%s2802_s7 + $0x48] sm:$0xf]  ;;  %v2353_v48 = vld [vmem:[%s2802_s7 + $0x54] sm:$0xf0]  ;;  %v3007_v49 = vor.u32 %v2355_v40, %v2213_v41 }
  0x71   : > { %937 = vmatpush.bf16.msrb.mxu3 %v2927_v61  ;;  %v3010_v50 = vor.u32 %v2350_v42, %v2189_v43  ;;  %v3013_v52 = vor.u32 %v2353_v48, %v2195_v47  ;;  %v2171_v53 = vld [vmem:[%s2802_s7 + $0x20] sm:$0xf]  ;;  %v2348_v54 = vld [vmem:[%s2802_s7 + $0x2c] sm:$0xf0]  ;;  %v2346_v55 = vld [vmem:[%s2802_s7 + $0x24] sm:$0xf] }
  0x72   : > { %899 = vmatpush.bf16.msrb.mxu0 %v2923_v58  ;;  %v3020_v56 = vor.u32 %v2348_v54, %v2171_v53  ;;  %v2173_v59 = vld [vmem:[%s2802_s7 + $0x30] sm:$0xf0]  ;;  %v2179_v60 = vld [vmem:[%s2802_s7 + $0x28] sm:$0xf]  ;;  %v2349_v62 = vld [vmem:[%s2802_s7 + $0x34] sm:$0xf0] }
  0x73   : > { %912 = vmatpush.bf16.msrb.mxu1 %v2931_v63  ;;  %v3026_v0 = vor.u32 %v2346_v55, %v2173_v59  ;;  %v2351_v1 = vld [vmem:[%s2802_s7 + $0x4c] sm:$0xf]  ;;  %v2197_v2 = vld [vmem:[%s2802_s7 + $0x58] sm:$0xf0]  ;;  %v2155_v3 = vld [vmem:[%s2802_s7] sm:$0xf]  ;;  %v3037_v12 = vor.u32 %v2349_v62, %v2179_v60 }
  0x74   : > { %925 = vmatpush.bf16.msrb.mxu2 %v2939_v5  ;;  %v3031_v4 = vor.u32 %v2351_v1, %v2197_v2  ;;  %v2344_v7 = vld [vmem:[%s2802_s7 + $0xc] sm:$0xf0]  ;;  %v2342_v8 = vld [vmem:[%s2802_s7 + $0x4] sm:$0xf]  ;;  %v2157_v10 = vld [vmem:[%s2802_s7 + $0x10] sm:$0xf0] }
  0x75   : > { %938 = vmatpush.bf16.msrb.mxu3 %v2947_v9  ;;  %v2347_v13 = vld [vmem:[%s2802_s7 + $0x2c] sm:$0xf]  ;;  %v2181_v14 = vld [vmem:[%s2802_s7 + $0x38] sm:$0xf0]  ;;  %v3043_v15 = vor.u32 %v2344_v7, %v2155_v3  ;;  %v2163_v18 = vld [vmem:[%s2802_s7 + $0x8] sm:$0xf]  ;;  %v3050_v21 = vor.u32 %v2342_v8, %v2157_v10 }
  0x76   : > { %900 = vmatpush.bf16.msrb.mxu0 %v2943_v6  ;;  %v3045_v16 = vor.u32 %v2347_v13, %v2181_v14  ;;  %v2345_v20 = vld [vmem:[%s2802_s7 + $0x14] sm:$0xf0]  ;;  %v2343_v23 = vld [vmem:[%s2802_s7 + $0xc] sm:$0xf]  ;;  %v2165_v25 = vld [vmem:[%s2802_s7 + $0x18] sm:$0xf0] }
  0x77   : > { %913 = vmatpush.bf16.msrb.mxu1 %v2951_v11  ;;  %v409_v26 = vld [vmem:[#allocation2 + $0x8] sm:$0xff]  ;;  %v410_v27 = vld [vmem:[#allocation2 + $0x20] sm:$0xff]  ;;  %v3055_v28 = vor.u32 %v2345_v20, %v2163_v18  ;;  %v3059_v29 = vor.u32 %v2343_v23, %v2165_v25  ;;  %v412_v34 = vld [vmem:[#allocation2 + $0x38] sm:$0xff] }
  0x78   : > { %926 = vmatpush.bf16.msrb.mxu2 %v2959_v17  ;;  %v415_v30 = vpack.c.bf16 %v410_v27, %v409_v26  ;;  %v411_v33 = vld [vmem:[#allocation2 + $0x28] sm:$0xff]  ;;  %v404_v41 = vld [vmem:[%s2813_s22] sm:$0xf] }
  0x79   : > { %939 = vmatpush.bf16.msrb.mxu3 %v2967_v22  ;;  %v416_v36 = vpack.c.bf16 %v412_v34, %v411_v33  ;;  %v418_v42 = vperm.slane %v404_v41, 0  ;;  %v419_v47 = vperm.slane %v404_v41, 1  ;;  %v3137_v60 = vperm.slane %v404_v41, 3 }
  0x7a   : > { %901 = vmatpush.bf16.msrb.mxu0 %v2963_v19  ;;  %v420_v62 = vperm.slane %v404_v41, 2 }
  0x7b   : > { %914 = vmatpush.bf16.msrb.mxu1 %v2971_v24 }
  0x7c   : > { %927 = vmatpush.bf16.msrb.mxu2 %v2979_v31 }
  0x7d   : > { %940 = vmatpush.bf16.msrb.mxu3 %v2987_v35  ;;  %599 = vmatmul.bf16.gmra.mxu0 %v414_v37 }
  0x7e   : > { %902 = vmatpush.bf16.msrb.mxu0 %v2983_v32  ;;  %628 = vmatmul.bf16.gmra.mxu1 %v414_v37 }
  0x7f   : > { %915 = vmatpush.bf16.msrb.mxu1 %v2991_v38  ;;  %657 = vmatmul.bf16.gmra.mxu2 %v414_v37 }
  0x80   : > { %686 = vmatmul.bf16.gmra.mxu3 %v414_v37  ;;  %928 = vmatpush.bf16.msrb.mxu2 %v2999_v44  ;;  %v2651_v37 = vmov 0  }
  0x81   : > { %941 = vmatpush.bf16.msrb.mxu3 %v3007_v49 }
  0x82   : > { %903 = vmatpush.bf16.msrb.mxu0 %v3003_v45 }
  0x83   : > { %916 = vmatpush.bf16.msrb.mxu1 %v3010_v50 }
  0x84   : > { %929 = vmatpush.bf16.msrb.mxu2 %v3013_v52 }
  0x85   : > { %942 = vmatpush.bf16.msrb.mxu3 %v3031_v4 }
  0x86   : > { %904 = vmatpush.bf16.msrb.mxu0 %v3020_v56 }
  0x87   : > { %917 = vmatpush.bf16.msrb.mxu1 %v3026_v0 }
  0x88   : > { %930 = vmatpush.bf16.msrb.mxu2 %v3037_v12 }
  0x89   : > { %943 = vmatpush.bf16.msrb.mxu3 %v3045_v16 }
  0x8a   : > { %905 = vmatpush.bf16.msrb.mxu0 %v3043_v15 }
  0x8b   : > { %918 = vmatpush.bf16.msrb.mxu1 %v3050_v21 }
  0x8c   : > { %931 = vmatpush.bf16.msrb.mxu2 %v3055_v28 }
  0x8d   : > { %944 = vmatpush.bf16.msrb.mxu3 %v3059_v29  ;;  %604 = vmatmul.bf16.gmra.mxu0 %v415_v30 }
  0x8e   : > { %1023 = vmatpush.bf16.msra.mxu0 %v2908_v46  ;;  %633 = vmatmul.bf16.gmra.mxu1 %v415_v30 }
  0x8f   : > { %1036 = vmatpush.bf16.msra.mxu1 %v2913_v51  ;;  %662 = vmatmul.bf16.gmra.mxu2 %v415_v30 }
  0x90   : > { %1049 = vmatpush.bf16.msra.mxu2 %v2920_v57  ;;  %691 = vmatmul.bf16.gmra.mxu3 %v415_v30 }
  0x91   : > { %1062 = vmatpush.bf16.msra.mxu3 %v2927_v61 }
  0x92   : > { %1024 = vmatpush.bf16.msra.mxu0 %v2923_v58 }
  0x93   : > { %1037 = vmatpush.bf16.msra.mxu1 %v2931_v63 }
  0x94   : > { %1050 = vmatpush.bf16.msra.mxu2 %v2939_v5 }
  0x95   : > { %1063 = vmatpush.bf16.msra.mxu3 %v2947_v9 }
  0x96   : > { %1025 = vmatpush.bf16.msra.mxu0 %v2943_v6 }
  0x97   : > { %1038 = vmatpush.bf16.msra.mxu1 %v2951_v11 }
  0x98   : > { %1051 = vmatpush.bf16.msra.mxu2 %v2959_v17 }
  0x99   : > { %1064 = vmatpush.bf16.msra.mxu3 %v2967_v22 }
  0x9a   : > { %1026 = vmatpush.bf16.msra.mxu0 %v2963_v19 }
  0x9b   : > { %1039 = vmatpush.bf16.msra.mxu1 %v2971_v24 }
  0x9c   : > { %1052 = vmatpush.bf16.msra.mxu2 %v2979_v31 }
  0x9d   : > { %1065 = vmatpush.bf16.msra.mxu3 %v2987_v35  ;;  %609 = vmatmul.bf16.gmra.mxu0 %v416_v36 }
  0x9e   : > { %1027 = vmatpush.bf16.msra.mxu0 %v2983_v32  ;;  %638 = vmatmul.bf16.gmra.mxu1 %v416_v36 }
  0x9f   : > { %1040 = vmatpush.bf16.msra.mxu1 %v2991_v38  ;;  %667 = vmatmul.bf16.gmra.mxu2 %v416_v36 }
  0xa0   : > { %1053 = vmatpush.bf16.msra.mxu2 %v2999_v44  ;;  %696 = vmatmul.bf16.gmra.mxu3 %v416_v36 }
  0xa1   : > { %1066 = vmatpush.bf16.msra.mxu3 %v3007_v49 }
  0xa2   : > { %1028 = vmatpush.bf16.msra.mxu0 %v3003_v45 }
  0xa3   : > { %1041 = vmatpush.bf16.msra.mxu1 %v3010_v50 }
  0xa4   : > { %1054 = vmatpush.bf16.msra.mxu2 %v3013_v52 }
  0xa5   : > { %1067 = vmatpush.bf16.msra.mxu3 %v3031_v4 }
  0xa6   : > { %1029 = vmatpush.bf16.msra.mxu0 %v3020_v56 }
  0xa7   : > { %1042 = vmatpush.bf16.msra.mxu1 %v3026_v0 }
  0xa8   : > { %1055 = vmatpush.bf16.msra.mxu2 %v3037_v12 }
  0xa9   : > { %1068 = vmatpush.bf16.msra.mxu3 %v3045_v16 }
  0xaa   : > { %1030 = vmatpush.bf16.msra.mxu0 %v3043_v15 }
  0xab   : > { %1043 = vmatpush.bf16.msra.mxu1 %v3050_v21 }
  0xac   : > { %1056 = vmatpush.bf16.msra.mxu2 %v3055_v28 }
  0xad   : > { %1069 = vmatpush.bf16.msra.mxu3 %v3059_v29  ;;  %906 = vmatmul.bf16.vlgmr.msrb.gmra.mxu0 %v2651_v37 }
  0xae   : > { %919 = vmatmul.bf16.vlgmr.msrb.gmra.mxu1 %v2651_v37  ;;  %1148 = vmatpush.bf16.msrb.mxu0 %v2908_v46 }
  0xaf   : > { %932 = vmatmul.bf16.vlgmr.msrb.gmra.mxu2 %v2651_v37  ;;  %1161 = vmatpush.bf16.msrb.mxu1 %v2913_v51 }
  0xb0   : > { %945 = vmatmul.bf16.vlgmr.msrb.gmra.mxu3 %v2651_v37  ;;  %1174 = vmatpush.bf16.msrb.mxu2 %v2920_v57 }
  0xb1   : > { %1187 = vmatpush.bf16.msrb.mxu3 %v2927_v61 }
  0xb2   : > { %1149 = vmatpush.bf16.msrb.mxu0 %v2923_v58 }
  0xb3   : > { %1162 = vmatpush.bf16.msrb.mxu1 %v2931_v63 }
  0xb4   : > { %1175 = vmatpush.bf16.msrb.mxu2 %v2939_v5 }
  0xb5   : > { %1188 = vmatpush.bf16.msrb.mxu3 %v2947_v9 }
  0xb6   : > { %1150 = vmatpush.bf16.msrb.mxu0 %v2943_v6 }
  0xb7   : > { %1163 = vmatpush.bf16.msrb.mxu1 %v2951_v11 }
  0xb8   : > { %1176 = vmatpush.bf16.msrb.mxu2 %v2959_v17 }
  0xb9   : > { %1189 = vmatpush.bf16.msrb.mxu3 %v2967_v22 }
  0xba   : > { %1151 = vmatpush.bf16.msrb.mxu0 %v2963_v19 }
  0xbb   : > { %1164 = vmatpush.bf16.msrb.mxu1 %v2971_v24 }
  0xbc   : > { %1177 = vmatpush.bf16.msrb.mxu2 %v2979_v31 }
  0xbd   : > { %1190 = vmatpush.bf16.msrb.mxu3 %v2987_v35 }
  0xbe   : > { %1152 = vmatpush.bf16.msrb.mxu0 %v2983_v32 }
  0xbf   : > { %1165 = vmatpush.bf16.msrb.mxu1 %v2991_v38 }
  0xc0   : > { %1178 = vmatpush.bf16.msrb.mxu2 %v2999_v44 }
  0xc1   : > { %1191 = vmatpush.bf16.msrb.mxu3 %v3007_v49 }
  0xc2   : > { %1153 = vmatpush.bf16.msrb.mxu0 %v3003_v45 }
  0xc3   : > { %1166 = vmatpush.bf16.msrb.mxu1 %v3010_v50 }
  0xc4   : > { %1179 = vmatpush.bf16.msrb.mxu2 %v3013_v52 }
  0xc5   : > { %1192 = vmatpush.bf16.msrb.mxu3 %v3031_v4 }
  0xc6   : > { %1154 = vmatpush.bf16.msrb.mxu0 %v3020_v56 }
  0xc7   : > { %1167 = vmatpush.bf16.msrb.mxu1 %v3026_v0 }
  0xc8   : > { %1180 = vmatpush.bf16.msrb.mxu2 %v3037_v12 }
  0xc9   : > { %1193 = vmatpush.bf16.msrb.mxu3 %v3045_v16 }
  0xca   : > { %1155 = vmatpush.bf16.msrb.mxu0 %v3043_v15 }
  0xcb   : > { %1168 = vmatpush.bf16.msrb.mxu1 %v3050_v21 }
  0xcc   : > { %1181 = vmatpush.bf16.msrb.mxu2 %v3055_v28 }
  0xcd   : > { %1194 = vmatpush.bf16.msrb.mxu3 %v3059_v29 }
  0xea   : > { %v595_v39 = vpop.f32.mrf.mxu0 }
  0xeb   : > { %v624_v40 = vpop.f32.mrf.mxu1 }
  0xf2   : > { %v3129_v43 = vpop.f32.mrf.mxu2  ;;  %v597_v53 = vpop.f32.mrf.mxu0 }
  0xf3   : > { %v3131_v48 = vpop.f32.mrf.mxu3  ;;  %v3133_v54 = vadd.f32 %v597_v53, %v418_v42  ;;  %v626_v55 = vpop.f32.mrf.mxu1 }
  0xf4   : > { %v3135_v59 = vadd.f32 %v626_v55, %v419_v47 }
  0xfa   : > { %v655_v1 = vpop.f32.mrf.mxu2  ;;  %v600_v7 = vpop.f32.mrf.mxu0 }
  0xfb   : > { %v3139_v2 = vadd.f32 %v655_v1, %v420_v62  ;;  %v684_v3 = vpop.f32.mrf.mxu3  ;;  %v3144_v10 = vadd.f32 %v600_v7, %v418_v42  ;;  %v629_v13 = vpop.f32.mrf.mxu1 }
  0xfc   : > { %v3142_v8 = vadd.f32 %v684_v3, %v3137_v60  ;;  %v3146_v14 = vadd.f32 %v629_v13, %v419_v47 }
 0x102   : > { %v658_v18 = vpop.f32.mrf.mxu2  ;;  %v602_v25 = vpop.f32.mrf.mxu0 }
 0x103   : > { %v3148_v20 = vadd.f32 %v658_v18, %v420_v62  ;;  %v687_v23 = vpop.f32.mrf.mxu3  ;;  %v3153_v27 = vadd.f32 %v602_v25, %v418_v42  ;;  %v631_v30 = vpop.f32.mrf.mxu1 }
 0x104   : > { %v3151_v26 = vadd.f32 %v687_v23, %v3137_v60  ;;  %v3155_v33 = vadd.f32 %v631_v30, %v419_v47 }
 0x105   : > { %3493 = vst [vmem:[#allocation11_spill] sm:$0xff] %v3148_v20 }
 0x106   : > { %3494 = vst [vmem:[#allocation12_spill] sm:$0xff] %v3151_v26 }
 0x107   : > { %3495 = vst [vmem:[#allocation13_spill] sm:$0xff] %v3153_v27 }
 0x108   : > { %3496 = vst [vmem:[#allocation14_spill] sm:$0xff] %v3155_v33 }
 0x10a   : > { %v660_v34 = vpop.f32.mrf.mxu2  ;;  %v605_v41 = vpop.f32.mrf.mxu0 }
 0x10b   : > { %v3157_v36 = vadd.f32 %v660_v34, %v420_v62  ;;  %v689_v37 = vpop.f32.mrf.mxu3  ;;  %v3162_v55 = vadd.f32 %v605_v41, %v418_v42  ;;  %v634_v1 = vpop.f32.mrf.mxu1 }
 0x10c   : > { %v3160_v53 = vadd.f32 %v689_v37, %v3137_v60  ;;  %v3164_v3 = vadd.f32 %v634_v1, %v419_v47 }
 0x10d   : > { %3497 = vst [vmem:[#allocation15_spill] sm:$0xff] %v3157_v36 }
 0x10e   : > { %3498 = vst [vmem:[#allocation16_spill] sm:$0xff] %v3160_v53 }
 0x10f   : > { %3499 = vst [vmem:[#allocation17_spill] sm:$0xff] %v3162_v55 }
 0x110   : > { %3500 = vst [vmem:[#allocation18_spill] sm:$0xff] %v3164_v3 }
 0x112   : > { %v663_v7 = vpop.f32.mrf.mxu2  ;;  %v607_v23 = vpop.f32.mrf.mxu0 }
 0x113   : > { %v3166_v13 = vadd.f32 %v663_v7, %v420_v62  ;;  %v692_v18 = vpop.f32.mrf.mxu3  ;;  %v3171_v30 = vadd.f32 %v607_v23, %v418_v42  ;;  %v636_v34 = vpop.f32.mrf.mxu1 }
 0x114   : > { %v3169_v25 = vadd.f32 %v692_v18, %v3137_v60  ;;  %v3173_v36 = vadd.f32 %v636_v34, %v419_v47 }
 0x115   : > { %3501 = vst [vmem:[#allocation19_spill] sm:$0xff] %v3166_v13 }
 0x116   : > { %3502 = vst [vmem:[#allocation20_spill] sm:$0xff] %v3169_v25 }
 0x117   : > { %3503 = vst [vmem:[#allocation21_spill] sm:$0xff] %v3171_v30 }
 0x118   : > { %3504 = vst [vmem:[#allocation22_spill] sm:$0xff] %v3173_v36 }
 0x11a   : > { %v665_v37 = vpop.f32.mrf.mxu2  ;;  %v610_v55 = vpop.f32.mrf.mxu0 }
 0x11b   : > { %v3175_v53 = vadd.f32 %v665_v37, %v420_v62  ;;  %v694_v41 = vpop.f32.mrf.mxu3  ;;  %v3180_v7 = vadd.f32 %v610_v55, %v418_v42  ;;  %v639_v13 = vpop.f32.mrf.mxu1  ;;  %v625_v55 = vadd.f32 %v624_v40, %v419_v47 }
 0x11c   : > { %v3178_v1 = vadd.f32 %v694_v41, %v3137_v60  ;;  %v3182_v3 = vadd.f32 %v639_v13, %v419_v47  ;;  %v596_v41 = vadd.f32 %v595_v39, %v418_v42 }
 0x11d   : > { %3505 = vst [vmem:[#allocation23_spill] sm:$0xff] %v3175_v53 }
 0x11e   : > { %3506 = vst [vmem:[#allocation24_spill] sm:$0xff] %v3178_v1 }
 0x11f   : > { %3507 = vst [vmem:[#allocation25_spill] sm:$0xff] %v3180_v7 }
 0x120   : > { %3508 = vst [vmem:[#allocation26_spill] sm:$0xff] %v3182_v3 }
 0x122   : > { %v668_v18 = vpop.f32.mrf.mxu2  ;;  %v612_v30 = vpop.f32.mrf.mxu0 }
 0x123   : > { %v3184_v25 = vadd.f32 %v668_v18, %v420_v62  ;;  %v697_v23 = vpop.f32.mrf.mxu3  ;;  %v3189_v37 = vadd.f32 %v612_v30, %v418_v42  ;;  %v641_v53 = vpop.f32.mrf.mxu1  ;;  %v654_v30 = vadd.f32 %v3129_v43, %v420_v62  ;;  %v683_v43 = vadd.f32 %v3131_v48, %v3137_v60 }
 0x124   : > { %v3187_v34 = vadd.f32 %v697_v23, %v3137_v60  ;;  %v3191_v36 = vadd.f32 %v641_v53, %v419_v47 }
 0x125   : > { %3509 = vst [vmem:[#allocation27_spill] sm:$0xff] %v3184_v25 }
 0x126   : > { %3510 = vst [vmem:[#allocation28_spill] sm:$0xff] %v3187_v34 }
 0x127   : > { %3511 = vst [vmem:[#allocation29_spill] sm:$0xff] %v3189_v37 }
 0x128   : > { %3512 = vst [vmem:[#allocation30_spill] sm:$0xff] %v3191_v36 }
 0x12a   : > { %v670_v1 = vpop.f32.mrf.mxu2  ;;  %v907_v3 = vpop.f32.mrf.mxu0 }
 0x12b   : > { %v3193_v7 = vadd.f32 %v670_v1, %v420_v62  ;;  %v699_v13 = vpop.f32.mrf.mxu3  ;;  %v950_v25 = vadd.f32 %v907_v3, %v596_v41  ;;  %v920_v33 = vpop.f32.mrf.mxu1 }
 0x12c   : > { %v3196_v18 = vadd.f32 %v699_v13, %v3137_v60  ;;  %v951_v27 = vadd.f32 %v920_v33, %v625_v55 }
 0x12d   : > { %3513 = vst [vmem:[#allocation31_spill] sm:$0xff] %v3193_v7  ;;  %v2281_v23 = vmul.f32 -1.442695, %v950_v25 }
 0x12e   : > { %3514 = vst [vmem:[#allocation32_spill] sm:$0xff] %v3196_v18  ;;  %v2282_v34 = vmul.f32 -1.442695, %v951_v27 }
 0x12f   : > { %2421 = vpow2.f32 %v2281_v23 }
 0x130   : > { %2423 = vpow2.f32 %v2282_v34 }
 0x132   : > { %v933_v53 = vpop.f32.mrf.mxu2  ;;  %v909_v40 = vpop.f32.mrf.mxu0 }
 0x133   : > { %v952_v39 = vadd.f32 %v933_v53, %v654_v30  ;;  %v946_v42 = vpop.f32.mrf.mxu3  ;;  %v922_v47 = vpop.f32.mrf.mxu1 }
 0x134   : > { %v953_v34 = vadd.f32 %v946_v42, %v683_v43 }
 0x135   : > { %v2283_v1 = vmul.f32 -1.442695, %v952_v39  ;;  %v2422_v7 = vpop.eup %2421 }
 0x136   : > { %v2424_v36 = vpop.eup %2423  ;;  %v963_v37 = vadd.f32 1.0, %v2422_v7 }
 0x137   : > { %2425 = vpow2.f32 %v2283_v1  ;;  %v964_v13 = vadd.f32 1.0, %v2424_v36 }
 0x138   : > { %2427 = vrcp.f32 %v963_v37  ;;  %v977_v7 = vand.u32 2147483648, %v963_v37  ;;  %v975_v40 = vand.u32 2147483647, %v963_v37  ;;  %vm971_vm2 = vweird.f32 %v963_v37 }
 0x139   : > { %2429 = vrcp.f32 %v964_v13  ;;  %v992_v36 = vand.u32 2147483648, %v964_v13  ;;  %v990_v1 = vand.u32 2147483647, %v964_v13  ;;  %vm986_vm3 = vweird.f32 %v964_v13 }
 0x13a   : > { %v935_v33 = vpop.f32.mrf.mxu2  ;;  %v978_v42 = vor.u32 1.1754944e-38, %v977_v7  ;;  %vm976_vm5 = vcmp.eq.f32.partialorder %v975_v40, 8.507059e+37 }
 0x13b   : > { %v948_v3 = vpop.f32.mrf.mxu3  ;;  %vm991_vm7 = vcmp.eq.f32.partialorder %v990_v1, 8.507059e+37 }
 0x13d   : > { %v2426_v27 = vpop.eup %2425 }
 0x13e   : > { %v965_v62 = vadd.f32 1.0, %v2426_v27  ;;  %v2428_v25 = vpop.eup %2427  ;;  %v993_v27 = vor.u32 1.1754944e-38, %v992_v36 }
 0x13f   : > { %v2430_v41 = vpop.eup %2429  ;;  %v967_v55 = vmul.f32 %v2428_v25, %v963_v37  ;;  %vm972_vm0 = vweird.f32 %v2428_v25 }
 0x140   : > { %2431 = vrcp.f32 %v965_v62  ;;  %v982_v23 = vmul.f32 %v2430_v41, %v964_v13  ;;  %vm987_vm1 = vweird.f32 %v2430_v41  ;;  %vm973_vm4 = vmor %vm971_vm2, %vm972_vm0  ;;  %v1007_v13 = vand.u32 2147483648, %v965_v62 }
 0x141   : > { %v968_v30 = vsub.f32 1.0, %v967_v55  ;;  %2433 = vtanh.f32 %v953_v34  ;;  %vm988_vm6 = vmor %vm986_vm3, %vm987_vm1  ;;  %vm1001_vm9 = vweird.f32 %v965_v62 }
 0x142   : > { %v983_v53 = vsub.f32 1.0, %v982_v23  ;;  %v1008_v36 = vor.u32 1.1754944e-38, %v1007_v13 }
 0x143   : > { %v969_v39 = vmul.f32 %v2428_v25, %v968_v30 }
 0x144   : > { %v984_v47 = vmul.f32 %v2430_v41, %v983_v53 }
 0x145   : > { %v970_v48 = vadd.f32 %v2428_v25, %v969_v39 }
 0x146   : > { %v2432_v33 = vpop.eup %2431  ;;  %v985_v3 = vadd.f32 %v2430_v41, %v984_v47 }
 0x147   : > { %v997_v60 = vmul.f32 %v2432_v33, %v965_v62  ;;  %v974_v43 = vsel %vm973_vm4, %v2428_v25, %v970_v48  ;;  %v2434_v34 = vpop.eup %2433  ;;  %vm1002_vm8 = vweird.f32 %v2432_v33  ;;  %v1005_v25 = vand.u32 2147483647, %v965_v62 }
 0x148   : > { %v979_v23 = vsel %vm976_vm5, %v978_v42, %v974_v43  ;;  %v989_v30 = vsel %vm988_vm6, %v2430_v41, %v985_v3  ;;  %vm1003_vm10 = vmor %vm1001_vm9, %vm1002_vm8 }
 0x149   : > { %v998_v55 = vsub.f32 1.0, %v997_v60  ;;  %v994_v53 = vsel %vm991_vm7, %v993_v27, %v989_v30  ;;  %v1013_v18 = vmul.f32 %v2434_v34, %v979_v23  ;;  %vm1006_vm11 = vcmp.eq.f32.partialorder %v1005_v25, 8.507059e+37 }
 0x14a   : > { %v1012_v20 = vmul.f32 0.0, %v994_v53 }
 0x14b   : > { %v999_v26 = vmul.f32 %v2432_v33, %v998_v55 }
 0x14c   : > { %v3201_v39 = vadd.f32 %v1013_v18, %v1012_v20 }
 0x14d   : > { %v1000_v37 = vadd.f32 %v2432_v33, %v999_v26 }
 0x14e   : > { %2435 = vtanh.f32 %v3201_v39 }
 0x14f   : > { %v1004_v7 = vsel %vm1003_vm10, %v2432_v33, %v1000_v37 }
 0x150   : > { %v1009_v41 = vsel %vm1006_vm11, %v1008_v36, %v1004_v7 }
 0x154   : > { %v2436_v40 = vpop.eup %2435 }
 0x155   : > { %v1016_v47 = vmul.f32 %v2436_v40, %v1009_v41 }
 0x157   : > { %1017 = vst [vmem:[#allocation2 + $0x30] sm:$0xff] %v1016_v47  ;;  %v1022_v1 = vpack.c.bf16 %v1016_v47, %v1016_v47 }
 0x159   : > { %1031 = vmatmul.bf16.vlgmr.msra.gmra.mxu0 %v1022_v1  ;;  %1044 = vmatmul.bf16.vlgmr.msra.gmra.mxu1 %v1022_v1 }
 0x15a   : > { %1057 = vmatmul.bf16.vlgmr.msra.gmra.mxu2 %v1022_v1  ;;  %1070 = vmatmul.bf16.vlgmr.msra.gmra.mxu3 %v1022_v1 }
 0x15b   : > { %1273 = vmatpush.bf16.msra.mxu0 %v2908_v46  ;;  %1286 = vmatpush.bf16.msra.mxu1 %v2913_v51 }
 0x15c   : > { %1299 = vmatpush.bf16.msra.mxu2 %v2920_v57  ;;  %1312 = vmatpush.bf16.msra.mxu3 %v2927_v61 }
 0x15f   : > { %1274 = vmatpush.bf16.msra.mxu0 %v2923_v58  ;;  %1287 = vmatpush.bf16.msra.mxu1 %v2931_v63 }
 0x160   : > { %1300 = vmatpush.bf16.msra.mxu2 %v2939_v5  ;;  %1313 = vmatpush.bf16.msra.mxu3 %v2947_v9 }
 0x163   : > { %1275 = vmatpush.bf16.msra.mxu0 %v2943_v6  ;;  %1288 = vmatpush.bf16.msra.mxu1 %v2951_v11 }
 0x164   : > { %1301 = vmatpush.bf16.msra.mxu2 %v2959_v17  ;;  %1314 = vmatpush.bf16.msra.mxu3 %v2967_v22 }
 0x167   : > { %1276 = vmatpush.bf16.msra.mxu0 %v2963_v19  ;;  %1289 = vmatpush.bf16.msra.mxu1 %v2971_v24 }
 0x168   : > { %1302 = vmatpush.bf16.msra.mxu2 %v2979_v31  ;;  %1315 = vmatpush.bf16.msra.mxu3 %v2987_v35 }
 0x16b   : > { %1277 = vmatpush.bf16.msra.mxu0 %v2983_v32  ;;  %1290 = vmatpush.bf16.msra.mxu1 %v2991_v38 }
 0x16c   : > { %1303 = vmatpush.bf16.msra.mxu2 %v2999_v44  ;;  %1316 = vmatpush.bf16.msra.mxu3 %v3007_v49 }
 0x16f   : > { %1278 = vmatpush.bf16.msra.mxu0 %v3003_v45  ;;  %1291 = vmatpush.bf16.msra.mxu1 %v3010_v50 }
 0x170   : > { %1304 = vmatpush.bf16.msra.mxu2 %v3013_v52  ;;  %1317 = vmatpush.bf16.msra.mxu3 %v3031_v4 }
 0x173   : > { %1279 = vmatpush.bf16.msra.mxu0 %v3020_v56  ;;  %1292 = vmatpush.bf16.msra.mxu1 %v3026_v0 }
 0x174   : > { %1305 = vmatpush.bf16.msra.mxu2 %v3037_v12  ;;  %1318 = vmatpush.bf16.msra.mxu3 %v3045_v16 }
 0x177   : > { %1280 = vmatpush.bf16.msra.mxu0 %v3043_v15  ;;  %1293 = vmatpush.bf16.msra.mxu1 %v3050_v21 }
 0x178   : > { %1306 = vmatpush.bf16.msra.mxu2 %v3055_v28  ;;  %1319 = vmatpush.bf16.msra.mxu3 %v3059_v29 }
 0x1d6   : > { %v1032_v20 = vpop.f32.mrf.mxu0  ;;  %v1045_v26 = vpop.f32.mrf.mxu1 }
 0x1d7   : > { %v1075_v18 = vadd.f32 %v1032_v20, %v3133_v54  ;;  %v1076_v62 = vadd.f32 %v1045_v26, %v3135_v59 }
 0x1d9   : > { %v2284_v33 = vmul.f32 -1.442695, %v1075_v18  ;;  %v2285_v48 = vmul.f32 -1.442695, %v1076_v62 }
 0x1db   : > { %2437 = vpow2.f32 %v2284_v33 }
 0x1dc   : > { %2439 = vpow2.f32 %v2285_v48 }
 0x1dd   : > { %v1058_v60 = vpop.f32.mrf.mxu2  ;;  %v1071_v42 = vpop.f32.mrf.mxu3 }
 0x1de   : > { %v1077_v3 = vadd.f32 %v1058_v60, %v3139_v2  ;;  %v1034_v27 = vpop.f32.mrf.mxu0  ;;  %v1047_v43 = vpop.f32.mrf.mxu1  ;;  %v1078_v7 = vadd.f32 %v1071_v42, %v3142_v8 }
 0x1e0   : > { %v2286_v34 = vmul.f32 -1.442695, %v1077_v3 }
 0x1e1   : > { %v2438_v55 = vpop.eup %2437 }
 0x1e2   : > { %v2440_v23 = vpop.eup %2439  ;;  %v1088_v30 = vadd.f32 1.0, %v2438_v55  ;;  %2441 = vpow2.f32 %v2286_v34 }
 0x1e3   : > { %v1089_v53 = vadd.f32 1.0, %v2440_v23 }
 0x1e4   : > { %2443 = vrcp.f32 %v1088_v30  ;;  %v1102_v1 = vand.u32 2147483648, %v1088_v30  ;;  %v1100_v18 = vand.u32 2147483647, %v1088_v30  ;;  %vm1096_vm14 = vweird.f32 %v1088_v30 }
 0x1e5   : > { %2445 = vrcp.f32 %v1089_v53  ;;  %v1060_v54 = vpop.f32.mrf.mxu2  ;;  %v1073_v59 = vpop.f32.mrf.mxu3  ;;  %v1117_v20 = vand.u32 2147483648, %v1089_v53  ;;  %v1115_v33 = vand.u32 2147483647, %v1089_v53  ;;  %vm1111_vm15 = vweird.f32 %v1089_v53 }
 0x1e6   : > { %v1103_v42 = vor.u32 1.1754944e-38, %v1102_v1  ;;  %vm1101_vm2 = vcmp.eq.f32.partialorder %v1100_v18, 8.507059e+37 }
 0x1e7   : > { %v1118_v27 = vor.u32 1.1754944e-38, %v1117_v20  ;;  %vm1116_vm3 = vcmp.eq.f32.partialorder %v1115_v33, 8.507059e+37 }
 0x1e8   : > { %v2442_v37 = vpop.eup %2441 }
 0x1e9   : > { %v1090_v13 = vadd.f32 1.0, %v2442_v37 }
 0x1ea   : > { %v2444_v25 = vpop.eup %2443 }
 0x1eb   : > { %v2446_v36 = vpop.eup %2445  ;;  %v1092_v40 = vmul.f32 %v2444_v25, %v1088_v30  ;;  %2447 = vrcp.f32 %v1090_v13  ;;  %vm1097_vm12 = vweird.f32 %v2444_v25  ;;  %vm1126_vm5 = vweird.f32 %v1090_v13 }
 0x1ec   : > { %v1107_v2 = vmul.f32 %v2446_v36, %v1089_v53  ;;  %2449 = vtanh.f32 %v1078_v7  ;;  %vm1112_vm13 = vweird.f32 %v2446_v36  ;;  %vm1098_vm0 = vmor %vm1096_vm14, %vm1097_vm12 }
 0x1ed   : > { %v1093_v41 = vsub.f32 1.0, %v1092_v40  ;;  %vm1113_vm1 = vmor %vm1111_vm15, %vm1112_vm13 }
 0x1ee   : > { %v1108_v47 = vsub.f32 1.0, %v1107_v2  ;;  %v1132_v2 = vand.u32 2147483648, %v1090_v13 }
 0x1ef   : > { %v1094_v26 = vmul.f32 %v2444_v25, %v1093_v41 }
 0x1f0   : > { %v1109_v62 = vmul.f32 %v2446_v36, %v1108_v47  ;;  %v1133_v47 = vor.u32 1.1754944e-38, %v1132_v2 }
 0x1f1   : > { %v2448_v48 = vpop.eup %2447  ;;  %v1095_v60 = vadd.f32 %v2444_v25, %v1094_v26 }
 0x1f2   : > { %v1122_v8 = vmul.f32 %v2448_v48, %v1090_v13  ;;  %v1110_v3 = vadd.f32 %v2446_v36, %v1109_v62  ;;  %v2450_v34 = vpop.eup %2449  ;;  %vm1127_vm4 = vweird.f32 %v2448_v48 }
 0x1f3   : > { %v1099_v43 = vsel %vm1098_vm0, %v2444_v25, %v1095_v60  ;;  %v1130_v25 = vand.u32 2147483647, %v1090_v13  ;;  %vm1128_vm6 = vmor %vm1126_vm5, %vm1127_vm4 }
 0x1f4   : > { %v1123_v55 = vsub.f32 1.0, %v1122_v8  ;;  %v1104_v23 = vsel %vm1101_vm2, %v1103_v42, %v1099_v43  ;;  %v1114_v54 = vsel %vm1113_vm1, %v2446_v36, %v1110_v3  ;;  %v3515_v42 = vld [vmem:[#allocation11_spill] sm:$0xff] }
 0x1f5   : > { %v1119_v59 = vsel %vm1116_vm3, %v1118_v27, %v1114_v54  ;;  %v1138_v37 = vmul.f32 %v2450_v34, %v1104_v23  ;;  %vm1131_vm7 = vcmp.eq.f32.partialorder %v1130_v25, 8.507059e+37 }
 0x1f6   : > { %v1124_v7 = vmul.f32 %v2448_v48, %v1123_v55  ;;  %v1137_v40 = vmul.f32 %v1119_v59, %v3201_v39 }
 0x1f8   : > { %v3241_v30 = vadd.f32 %v1138_v37, %v1137_v40  ;;  %v1125_v53 = vadd.f32 %v2448_v48, %v1124_v7 }
 0x1fa   : > { %2451 = vtanh.f32 %v3241_v30  ;;  %v1129_v41 = vsel %vm1128_vm6, %v2448_v48, %v1125_v53  ;;  %v3516_v53 = vld [vmem:[#allocation12_spill] sm:$0xff] }
 0x1fb   : > { %v1134_v1 = vsel %vm1131_vm7, %v1133_v47, %v1129_v41 }
 0x200   : > { %v2452_v36 = vpop.eup %2451 }
 0x201   : > { %v1141_v20 = vmul.f32 %v2452_v36, %v1134_v1 }
 0x203   : > { %1142 = vst [vmem:[#allocation2] sm:$0xff] %v1141_v20  ;;  %v1147_v26 = vpack.c.bf16 %v1141_v20, %v1141_v20 }
 0x205   : > { %1156 = vmatmul.bf16.vlgmr.msrb.gmra.mxu0 %v1147_v26  ;;  %1169 = vmatmul.bf16.vlgmr.msrb.gmra.mxu1 %v1147_v26 }
 0x206   : > { %1182 = vmatmul.bf16.vlgmr.msrb.gmra.mxu2 %v1147_v26  ;;  %1195 = vmatmul.bf16.vlgmr.msrb.gmra.mxu3 %v1147_v26 }
 0x207   : > { %1398 = vmatpush.bf16.msrb.mxu0 %v2908_v46  ;;  %1411 = vmatpush.bf16.msrb.mxu1 %v2913_v51 }
 0x208   : > { %1424 = vmatpush.bf16.msrb.mxu2 %v2920_v57  ;;  %1437 = vmatpush.bf16.msrb.mxu3 %v2927_v61 }
 0x20b   : > { %1399 = vmatpush.bf16.msrb.mxu0 %v2923_v58  ;;  %1412 = vmatpush.bf16.msrb.mxu1 %v2931_v63 }
 0x20c   : > { %1425 = vmatpush.bf16.msrb.mxu2 %v2939_v5  ;;  %1438 = vmatpush.bf16.msrb.mxu3 %v2947_v9 }
 0x20f   : > { %1400 = vmatpush.bf16.msrb.mxu0 %v2943_v6  ;;  %1413 = vmatpush.bf16.msrb.mxu1 %v2951_v11 }
 0x210   : > { %1426 = vmatpush.bf16.msrb.mxu2 %v2959_v17  ;;  %1439 = vmatpush.bf16.msrb.mxu3 %v2967_v22 }
 0x213   : > { %1401 = vmatpush.bf16.msrb.mxu0 %v2963_v19  ;;  %1414 = vmatpush.bf16.msrb.mxu1 %v2971_v24 }
 0x214   : > { %1427 = vmatpush.bf16.msrb.mxu2 %v2979_v31  ;;  %1440 = vmatpush.bf16.msrb.mxu3 %v2987_v35 }
 0x217   : > { %1402 = vmatpush.bf16.msrb.mxu0 %v2983_v32  ;;  %1415 = vmatpush.bf16.msrb.mxu1 %v2991_v38 }
 0x218   : > { %1428 = vmatpush.bf16.msrb.mxu2 %v2999_v44  ;;  %1441 = vmatpush.bf16.msrb.mxu3 %v3007_v49 }
 0x21b   : > { %1403 = vmatpush.bf16.msrb.mxu0 %v3003_v45  ;;  %1416 = vmatpush.bf16.msrb.mxu1 %v3010_v50 }
 0x21c   : > { %1429 = vmatpush.bf16.msrb.mxu2 %v3013_v52  ;;  %1442 = vmatpush.bf16.msrb.mxu3 %v3031_v4 }
 0x21f   : > { %1404 = vmatpush.bf16.msrb.mxu0 %v3020_v56  ;;  %1417 = vmatpush.bf16.msrb.mxu1 %v3026_v0 }
 0x220   : > { %1430 = vmatpush.bf16.msrb.mxu2 %v3037_v12  ;;  %1443 = vmatpush.bf16.msrb.mxu3 %v3045_v16 }
 0x223   : > { %1405 = vmatpush.bf16.msrb.mxu0 %v3043_v15  ;;  %1418 = vmatpush.bf16.msrb.mxu1 %v3050_v21 }
 0x224   : > { %1431 = vmatpush.bf16.msrb.mxu2 %v3055_v28  ;;  %1444 = vmatpush.bf16.msrb.mxu3 %v3059_v29 }
 0x282   : > { %v1157_v39 = vpop.f32.mrf.mxu0  ;;  %v1170_v13 = vpop.f32.mrf.mxu1 }
 0x283   : > { %v1200_v18 = vadd.f32 %v1157_v39, %v3144_v10  ;;  %v1201_v62 = vadd.f32 %v1170_v13, %v3146_v14 }
 0x285   : > { %v2287_v33 = vmul.f32 -1.442695, %v1200_v18  ;;  %v2288_v48 = vmul.f32 -1.442695, %v1201_v62 }
 0x287   : > { %2453 = vpow2.f32 %v2287_v33 }
 0x288   : > { %2455 = vpow2.f32 %v2288_v48 }
 0x289   : > { %v1183_v60 = vpop.f32.mrf.mxu2  ;;  %v1196_v8 = vpop.f32.mrf.mxu3 }
 0x28a   : > { %v1202_v3 = vadd.f32 %v1183_v60, %v3515_v42  ;;  %v1159_v27 = vpop.f32.mrf.mxu0  ;;  %v1172_v43 = vpop.f32.mrf.mxu1  ;;  %v1203_v2 = vadd.f32 %v1196_v8, %v3516_v53 }
 0x28c   : > { %v2289_v34 = vmul.f32 -1.442695, %v1202_v3 }
 0x28d   : > { %v2454_v55 = vpop.eup %2453 }
 0x28e   : > { %v2456_v23 = vpop.eup %2455  ;;  %v1213_v54 = vadd.f32 1.0, %v2454_v55  ;;  %2457 = vpow2.f32 %v2289_v34 }
 0x28f   : > { %v1214_v59 = vadd.f32 1.0, %v2456_v23 }
 0x290   : > { %2459 = vrcp.f32 %v1213_v54  ;;  %v1227_v20 = vand.u32 2147483648, %v1213_v54  ;;  %v1225_v13 = vand.u32 2147483647, %v1213_v54  ;;  %vm1221_vm10 = vweird.f32 %v1213_v54 }
 0x291   : > { %2461 = vrcp.f32 %v1214_v59  ;;  %v1185_v10 = vpop.f32.mrf.mxu2  ;;  %v1198_v14 = vpop.f32.mrf.mxu3  ;;  %v1242_v26 = vand.u32 2147483648, %v1214_v59  ;;  %v1240_v62 = vand.u32 2147483647, %v1214_v59  ;;  %vm1236_vm11 = vweird.f32 %v1214_v59 }
 0x292   : > { %v1228_v8 = vor.u32 1.1754944e-38, %v1227_v20  ;;  %vm1226_vm14 = vcmp.eq.f32.partialorder %v1225_v13, 8.507059e+37  ;;  %v3518_v13 = vld [vmem:[#allocation14_spill] sm:$0xff] }
 0x293   : > { %v1243_v3 = vor.u32 1.1754944e-38, %v1242_v26  ;;  %vm1241_vm15 = vcmp.eq.f32.partialorder %v1240_v62, 8.507059e+37  ;;  %v3517_v26 = vld [vmem:[#allocation13_spill] sm:$0xff] }
 0x294   : > { %v2458_v37 = vpop.eup %2457 }
 0x295   : > { %v1215_v7 = vadd.f32 1.0, %v2458_v37 }
 0x296   : > { %v2460_v40 = vpop.eup %2459 }
 0x297   : > { %v2462_v25 = vpop.eup %2461  ;;  %v1217_v41 = vmul.f32 %v2460_v40, %v1213_v54  ;;  %2463 = vrcp.f32 %v1215_v7  ;;  %vm1222_vm8 = vweird.f32 %v2460_v40  ;;  %vm1251_vm1 = vweird.f32 %v1215_v7 }
 0x298   : > { %v1232_v47 = vmul.f32 %v2462_v25, %v1214_v59  ;;  %2465 = vtanh.f32 %v1203_v2  ;;  %vm1237_vm9 = vweird.f32 %v2462_v25  ;;  %vm1223_vm12 = vmor %vm1221_vm10, %vm1222_vm8  ;;  %v1257_v2 = vand.u32 2147483648, %v1215_v7 }
 0x299   : > { %v1218_v36 = vsub.f32 1.0, %v1217_v41  ;;  %vm1238_vm13 = vmor %vm1236_vm11, %vm1237_vm9 }
 0x29a   : > { %v1233_v1 = vsub.f32 1.0, %v1232_v47  ;;  %v1258_v47 = vor.u32 1.1754944e-38, %v1257_v2 }
 0x29b   : > { %v1219_v39 = vmul.f32 %v2460_v40, %v1218_v36 }
 0x29c   : > { %v1234_v18 = vmul.f32 %v2462_v25, %v1233_v1 }
 0x29d   : > { %v2464_v33 = vpop.eup %2463  ;;  %v1220_v48 = vadd.f32 %v2460_v40, %v1219_v39 }
 0x29e   : > { %v1247_v60 = vmul.f32 %v2464_v33, %v1215_v7  ;;  %v1235_v42 = vadd.f32 %v2462_v25, %v1234_v18  ;;  %v2466_v43 = vpop.eup %2465  ;;  %vm1252_vm0 = vweird.f32 %v2464_v33 }
 0x29f   : > { %v1224_v27 = vsel %vm1223_vm12, %v2460_v40, %v1220_v48  ;;  %v1255_v40 = vand.u32 2147483647, %v1215_v7  ;;  %vm1253_vm2 = vmor %vm1251_vm1, %vm1252_vm0 }
 0x2a0   : > { %v1248_v34 = vsub.f32 1.0, %v1247_v60  ;;  %v1229_v55 = vsel %vm1226_vm14, %v1228_v8, %v1224_v27  ;;  %v1239_v23 = vsel %vm1238_vm13, %v2462_v25, %v1235_v42  ;;  %v3519_v8 = vld [vmem:[#allocation15_spill] sm:$0xff] }
 0x2a1   : > { %v1244_v10 = vsel %vm1241_vm15, %v1243_v3, %v1239_v23  ;;  %v1263_v14 = vmul.f32 %v2466_v43, %v1229_v55  ;;  %vm1256_vm3 = vcmp.eq.f32.partialorder %v1255_v40, 8.507059e+37  ;;  %v3520_v40 = vld [vmem:[#allocation16_spill] sm:$0xff] }
 0x2a2   : > { %v1249_v37 = vmul.f32 %v2464_v33, %v1248_v34  ;;  %v1262_v53 = vmul.f32 %v1244_v10, %v3241_v30 }
 0x2a4   : > { %v3281_v54 = vadd.f32 %v1263_v14, %v1262_v53  ;;  %v1250_v59 = vadd.f32 %v2464_v33, %v1249_v37 }
 0x2a6   : > { %2467 = vtanh.f32 %v3281_v54  ;;  %v1254_v41 = vsel %vm1253_vm2, %v2464_v33, %v1250_v59 }
 0x2a7   : > { %v1259_v36 = vsel %vm1256_vm3, %v1258_v47, %v1254_v41 }
 0x2ac   : > { %v2468_v25 = vpop.eup %2467 }
 0x2ad   : > { %v1266_v1 = vmul.f32 %v2468_v25, %v1259_v36 }
 0x2af   : > { %1267 = vst [vmem:[#allocation2 + $0x18] sm:$0xff] %v1266_v1  ;;  %v1272_v20 = vpack.c.bf16 %v1266_v1, %v1266_v1 }
 0x2b1   : > { %1281 = vmatmul.bf16.vlgmr.msra.gmra.mxu0 %v1272_v20  ;;  %1294 = vmatmul.bf16.vlgmr.msra.gmra.mxu1 %v1272_v20 }
 0x2b2   : > { %1307 = vmatmul.bf16.vlgmr.msra.gmra.mxu2 %v1272_v20  ;;  %1320 = vmatmul.bf16.vlgmr.msra.gmra.mxu3 %v1272_v20 }
 0x2b3   : > { %1523 = vmatpush.bf16.msra.mxu0 %v2908_v46  ;;  %1536 = vmatpush.bf16.msra.mxu1 %v2913_v51 }
 0x2b4   : > { %1549 = vmatpush.bf16.msra.mxu2 %v2920_v57  ;;  %1562 = vmatpush.bf16.msra.mxu3 %v2927_v61 }
 0x2b7   : > { %1524 = vmatpush.bf16.msra.mxu0 %v2923_v58  ;;  %1537 = vmatpush.bf16.msra.mxu1 %v2931_v63 }
 0x2b8   : > { %1550 = vmatpush.bf16.msra.mxu2 %v2939_v5  ;;  %1563 = vmatpush.bf16.msra.mxu3 %v2947_v9 }
 0x2bb   : > { %1525 = vmatpush.bf16.msra.mxu0 %v2943_v6  ;;  %1538 = vmatpush.bf16.msra.mxu1 %v2951_v11 }
 0x2bc   : > { %1551 = vmatpush.bf16.msra.mxu2 %v2959_v17  ;;  %1564 = vmatpush.bf16.msra.mxu3 %v2967_v22 }
 0x2bf   : > { %1526 = vmatpush.bf16.msra.mxu0 %v2963_v19  ;;  %1539 = vmatpush.bf16.msra.mxu1 %v2971_v24 }
 0x2c0   : > { %1552 = vmatpush.bf16.msra.mxu2 %v2979_v31  ;;  %1565 = vmatpush.bf16.msra.mxu3 %v2987_v35 }
 0x2c3   : > { %1527 = vmatpush.bf16.msra.mxu0 %v2983_v32  ;;  %1540 = vmatpush.bf16.msra.mxu1 %v2991_v38 }
 0x2c4   : > { %1553 = vmatpush.bf16.msra.mxu2 %v2999_v44  ;;  %1566 = vmatpush.bf16.msra.mxu3 %v3007_v49 }
 0x2c7   : > { %1528 = vmatpush.bf16.msra.mxu0 %v3003_v45  ;;  %1541 = vmatpush.bf16.msra.mxu1 %v3010_v50 }
 0x2c8   : > { %1554 = vmatpush.bf16.msra.mxu2 %v3013_v52  ;;  %1567 = vmatpush.bf16.msra.mxu3 %v3031_v4 }
 0x2cb   : > { %1529 = vmatpush.bf16.msra.mxu0 %v3020_v56  ;;  %1542 = vmatpush.bf16.msra.mxu1 %v3026_v0 }
 0x2cc   : > { %1555 = vmatpush.bf16.msra.mxu2 %v3037_v12  ;;  %1568 = vmatpush.bf16.msra.mxu3 %v3045_v16 }
 0x2cf   : > { %1530 = vmatpush.bf16.msra.mxu0 %v3043_v15  ;;  %1543 = vmatpush.bf16.msra.mxu1 %v3050_v21 }
 0x2d0   : > { %1556 = vmatpush.bf16.msra.mxu2 %v3055_v28  ;;  %1569 = vmatpush.bf16.msra.mxu3 %v3059_v29 }
 0x32e   : > { %v1282_v30 = vpop.f32.mrf.mxu0  ;;  %v1295_v7 = vpop.f32.mrf.mxu1 }
 0x32f   : > { %v1325_v39 = vadd.f32 %v1282_v30, %v3517_v26  ;;  %v1326_v18 = vadd.f32 %v1295_v7, %v3518_v13 }
 0x331   : > { %v2290_v62 = vmul.f32 -1.442695, %v1325_v39  ;;  %v2291_v33 = vmul.f32 -1.442695, %v1326_v18 }
 0x333   : > { %2469 = vpow2.f32 %v2290_v62 }
 0x334   : > { %2471 = vpow2.f32 %v2291_v33 }
 0x335   : > { %v1308_v48 = vpop.f32.mrf.mxu2  ;;  %v1321_v60 = vpop.f32.mrf.mxu3 }
 0x336   : > { %v1327_v42 = vadd.f32 %v1308_v48, %v3519_v8  ;;  %v1284_v3 = vpop.f32.mrf.mxu0  ;;  %v1297_v27 = vpop.f32.mrf.mxu1  ;;  %v1328_v41 = vadd.f32 %v1321_v60, %v3520_v40 }
 0x338   : > { %v2292_v43 = vmul.f32 -1.442695, %v1327_v42 }
 0x339   : > { %v2470_v34 = vpop.eup %2469 }
 0x33a   : > { %v2472_v55 = vpop.eup %2471  ;;  %v1338_v23 = vadd.f32 1.0, %v2470_v34  ;;  %2473 = vpow2.f32 %v2292_v43 }
 0x33b   : > { %v1339_v10 = vadd.f32 1.0, %v2472_v55 }
 0x33c   : > { %2475 = vrcp.f32 %v1338_v23  ;;  %v1352_v30 = vand.u32 2147483648, %v1338_v23  ;;  %v1350_v39 = vand.u32 2147483647, %v1338_v23  ;;  %vm1346_vm6 = vweird.f32 %v1338_v23 }
 0x33d   : > { %2477 = vrcp.f32 %v1339_v10  ;;  %v1310_v14 = vpop.f32.mrf.mxu2  ;;  %v1323_v37 = vpop.f32.mrf.mxu3  ;;  %v1367_v7 = vand.u32 2147483648, %v1339_v10  ;;  %v1365_v18 = vand.u32 2147483647, %v1339_v10  ;;  %vm1361_vm7 = vweird.f32 %v1339_v10 }
 0x33e   : > { %v1353_v60 = vor.u32 1.1754944e-38, %v1352_v30  ;;  %vm1351_vm10 = vcmp.eq.f32.partialorder %v1350_v39, 8.507059e+37  ;;  %v3522_v39 = vld [vmem:[#allocation18_spill] sm:$0xff] }
 0x33f   : > { %v1368_v42 = vor.u32 1.1754944e-38, %v1367_v7  ;;  %vm1366_vm11 = vcmp.eq.f32.partialorder %v1365_v18, 8.507059e+37  ;;  %v3521_v7 = vld [vmem:[#allocation17_spill] sm:$0xff] }
 0x340   : > { %v2474_v53 = vpop.eup %2473 }
 0x341   : > { %v1340_v59 = vadd.f32 1.0, %v2474_v53 }
 0x342   : > { %v2476_v2 = vpop.eup %2475 }
 0x343   : > { %v2478_v47 = vpop.eup %2477  ;;  %v1342_v25 = vmul.f32 %v2476_v2, %v1338_v23  ;;  %2479 = vrcp.f32 %v1340_v59  ;;  %vm1347_vm4 = vweird.f32 %v2476_v2  ;;  %vm1376_vm13 = vweird.f32 %v1340_v59 }
 0x344   : > { %v1357_v36 = vmul.f32 %v2478_v47, %v1339_v10  ;;  %2481 = vtanh.f32 %v1328_v41  ;;  %vm1362_vm5 = vweird.f32 %v2478_v47  ;;  %vm1348_vm8 = vmor %vm1346_vm6, %vm1347_vm4  ;;  %v1382_v41 = vand.u32 2147483648, %v1340_v59 }
 0x345   : > { %v1343_v1 = vsub.f32 1.0, %v1342_v25  ;;  %vm1363_vm9 = vmor %vm1361_vm7, %vm1362_vm5 }
 0x346   : > { %v1358_v20 = vsub.f32 1.0, %v1357_v36  ;;  %v1383_v36 = vor.u32 1.1754944e-38, %v1382_v41 }
 0x347   : > { %v1344_v26 = vmul.f32 %v2476_v2, %v1343_v1 }
 0x348   : > { %v1359_v13 = vmul.f32 %v2478_v47, %v1358_v20 }
 0x349   : > { %v2480_v62 = vpop.eup %2479  ;;  %v1345_v33 = vadd.f32 %v2476_v2, %v1344_v26 }
 0x34a   : > { %v1372_v48 = vmul.f32 %v2480_v62, %v1340_v59  ;;  %v1360_v8 = vadd.f32 %v2478_v47, %v1359_v13  ;;  %v2482_v27 = vpop.eup %2481  ;;  %vm1377_vm12 = vweird.f32 %v2480_v62 }
 0x34b   : > { %v1349_v3 = vsel %vm1348_vm8, %v2476_v2, %v1345_v33  ;;  %v1380_v2 = vand.u32 2147483647, %v1340_v59  ;;  %vm1378_vm14 = vmor %vm1376_vm13, %vm1377_vm12 }
 0x34c   : > { %v1373_v43 = vsub.f32 1.0, %v1372_v48  ;;  %v1354_v34 = vsel %vm1351_vm10, %v1353_v60, %v1349_v3  ;;  %v1364_v55 = vsel %vm1363_vm9, %v2478_v47, %v1360_v8  ;;  %v3523_v60 = vld [vmem:[#allocation19_spill] sm:$0xff] }
 0x34d   : > { %v1369_v14 = vsel %vm1366_vm11, %v1368_v42, %v1364_v55  ;;  %v1388_v37 = vmul.f32 %v2482_v27, %v1354_v34  ;;  %vm1381_vm15 = vcmp.eq.f32.partialorder %v1380_v2, 8.507059e+37  ;;  %v3524_v2 = vld [vmem:[#allocation20_spill] sm:$0xff] }
 0x34e   : > { %v1374_v53 = vmul.f32 %v2480_v62, %v1373_v43  ;;  %v1387_v40 = vmul.f32 %v1369_v14, %v3281_v54 }
 0x350   : > { %v3321_v23 = vadd.f32 %v1388_v37, %v1387_v40  ;;  %v1375_v10 = vadd.f32 %v2480_v62, %v1374_v53 }
 0x352   : > { %2483 = vtanh.f32 %v3321_v23  ;;  %v1379_v25 = vsel %vm1378_vm14, %v2480_v62, %v1375_v10 }
 0x353   : > { %v1384_v1 = vsel %vm1381_vm15, %v1383_v36, %v1379_v25 }
 0x358   : > { %v2484_v47 = vpop.eup %2483 }
 0x359   : > { %v1391_v20 = vmul.f32 %v2484_v47, %v1384_v1 }
 0x35b   : > { %1392 = vst [vmem:[#allocation2 + $0x10] sm:$0xff] %v1391_v20  ;;  %v1397_v30 = vpack.c.bf16 %v1391_v20, %v1391_v20 }
 0x35d   : > { %1406 = vmatmul.bf16.vlgmr.msrb.gmra.mxu0 %v1397_v30  ;;  %1419 = vmatmul.bf16.vlgmr.msrb.gmra.mxu1 %v1397_v30 }
 0x35e   : > { %1432 = vmatmul.bf16.vlgmr.msrb.gmra.mxu2 %v1397_v30  ;;  %1445 = vmatmul.bf16.vlgmr.msrb.gmra.mxu3 %v1397_v30 }
 0x35f   : > { %1648 = vmatpush.bf16.msrb.mxu0 %v2908_v46  ;;  %1661 = vmatpush.bf16.msrb.mxu1 %v2913_v51 }
 0x360   : > { %1674 = vmatpush.bf16.msrb.mxu2 %v2920_v57  ;;  %1687 = vmatpush.bf16.msrb.mxu3 %v2927_v61 }
 0x363   : > { %1649 = vmatpush.bf16.msrb.mxu0 %v2923_v58  ;;  %1662 = vmatpush.bf16.msrb.mxu1 %v2931_v63 }
 0x364   : > { %1675 = vmatpush.bf16.msrb.mxu2 %v2939_v5  ;;  %1688 = vmatpush.bf16.msrb.mxu3 %v2947_v9 }
 0x367   : > { %1650 = vmatpush.bf16.msrb.mxu0 %v2943_v6  ;;  %1663 = vmatpush.bf16.msrb.mxu1 %v2951_v11 }
 0x368   : > { %1676 = vmatpush.bf16.msrb.mxu2 %v2959_v17  ;;  %1689 = vmatpush.bf16.msrb.mxu3 %v2967_v22 }
 0x36b   : > { %1651 = vmatpush.bf16.msrb.mxu0 %v2963_v19  ;;  %1664 = vmatpush.bf16.msrb.mxu1 %v2971_v24 }
 0x36c   : > { %1677 = vmatpush.bf16.msrb.mxu2 %v2979_v31  ;;  %1690 = vmatpush.bf16.msrb.mxu3 %v2987_v35 }
 0x36f   : > { %1652 = vmatpush.bf16.msrb.mxu0 %v2983_v32  ;;  %1665 = vmatpush.bf16.msrb.mxu1 %v2991_v38 }
 0x370   : > { %1678 = vmatpush.bf16.msrb.mxu2 %v2999_v44  ;;  %1691 = vmatpush.bf16.msrb.mxu3 %v3007_v49 }
 0x373   : > { %1653 = vmatpush.bf16.msrb.mxu0 %v3003_v45  ;;  %1666 = vmatpush.bf16.msrb.mxu1 %v3010_v50 }
 0x374   : > { %1679 = vmatpush.bf16.msrb.mxu2 %v3013_v52  ;;  %1692 = vmatpush.bf16.msrb.mxu3 %v3031_v4 }
 0x377   : > { %1654 = vmatpush.bf16.msrb.mxu0 %v3020_v56  ;;  %1667 = vmatpush.bf16.msrb.mxu1 %v3026_v0 }
 0x378   : > { %1680 = vmatpush.bf16.msrb.mxu2 %v3037_v12  ;;  %1693 = vmatpush.bf16.msrb.mxu3 %v3045_v16 }
 0x37b   : > { %1655 = vmatpush.bf16.msrb.mxu0 %v3043_v15  ;;  %1668 = vmatpush.bf16.msrb.mxu1 %v3050_v21 }
 0x37c   : > { %1681 = vmatpush.bf16.msrb.mxu2 %v3055_v28  ;;  %1694 = vmatpush.bf16.msrb.mxu3 %v3059_v29 }
 0x3da   : > { %v1407_v54 = vpop.f32.mrf.mxu0  ;;  %v1420_v59 = vpop.f32.mrf.mxu1 }
 0x3db   : > { %v1450_v26 = vadd.f32 %v1407_v54, %v3521_v7  ;;  %v1451_v13 = vadd.f32 %v1420_v59, %v3522_v39 }
 0x3dd   : > { %v2293_v18 = vmul.f32 -1.442695, %v1450_v26  ;;  %v2294_v62 = vmul.f32 -1.442695, %v1451_v13 }
 0x3df   : > { %2485 = vpow2.f32 %v2293_v18 }
 0x3e0   : > { %2487 = vpow2.f32 %v2294_v62 }
 0x3e1   : > { %v1433_v33 = vpop.f32.mrf.mxu2  ;;  %v1446_v48 = vpop.f32.mrf.mxu3 }
 0x3e2   : > { %v1452_v8 = vadd.f32 %v1433_v33, %v3523_v60  ;;  %v1409_v42 = vpop.f32.mrf.mxu0  ;;  %v1422_v3 = vpop.f32.mrf.mxu1  ;;  %v1453_v25 = vadd.f32 %v1446_v48, %v3524_v2 }
 0x3e4   : > { %v2295_v27 = vmul.f32 -1.442695, %v1452_v8 }
 0x3e5   : > { %v2486_v43 = vpop.eup %2485 }
 0x3e6   : > { %v2488_v34 = vpop.eup %2487  ;;  %v1463_v55 = vadd.f32 1.0, %v2486_v43  ;;  %2489 = vpow2.f32 %v2295_v27 }
 0x3e7   : > { %v1464_v14 = vadd.f32 1.0, %v2488_v34 }
 0x3e8   : > { %2491 = vrcp.f32 %v1463_v55  ;;  %v1477_v54 = vand.u32 2147483648, %v1463_v55  ;;  %v1475_v26 = vand.u32 2147483647, %v1463_v55  ;;  %vm1471_vm2 = vweird.f32 %v1463_v55 }
 0x3e9   : > { %2493 = vrcp.f32 %v1464_v14  ;;  %v1435_v37 = vpop.f32.mrf.mxu2  ;;  %v1448_v53 = vpop.f32.mrf.mxu3  ;;  %v1492_v59 = vand.u32 2147483648, %v1464_v14  ;;  %v1490_v13 = vand.u32 2147483647, %v1464_v14  ;;  %vm1486_vm3 = vweird.f32 %v1464_v14 }
 0x3ea   : > { %v1478_v48 = vor.u32 1.1754944e-38, %v1477_v54  ;;  %vm1476_vm6 = vcmp.eq.f32.partialorder %v1475_v26, 8.507059e+37 }
 0x3eb   : > { %v1493_v8 = vor.u32 1.1754944e-38, %v1492_v59  ;;  %vm1491_vm7 = vcmp.eq.f32.partialorder %v1490_v13, 8.507059e+37 }
 0x3ec   : > { %v2490_v40 = vpop.eup %2489 }
 0x3ed   : > { %v1465_v10 = vadd.f32 1.0, %v2490_v40 }
 0x3ee   : > { %v2492_v41 = vpop.eup %2491 }
 0x3ef   : > { %v2494_v36 = vpop.eup %2493  ;;  %v1467_v47 = vmul.f32 %v2492_v41, %v1463_v55  ;;  %2495 = vrcp.f32 %v1465_v10  ;;  %vm1472_vm0 = vweird.f32 %v2492_v41  ;;  %vm1501_vm9 = vweird.f32 %v1465_v10 }
 0x3f0   : > { %v1482_v1 = vmul.f32 %v2494_v36, %v1464_v14  ;;  %2497 = vtanh.f32 %v1453_v25  ;;  %vm1487_vm1 = vweird.f32 %v2494_v36  ;;  %vm1473_vm4 = vmor %vm1471_vm2, %vm1472_vm0  ;;  %v1507_v25 = vand.u32 2147483648, %v1465_v10 }
 0x3f1   : > { %v1468_v20 = vsub.f32 1.0, %v1467_v47  ;;  %vm1488_vm5 = vmor %vm1486_vm3, %vm1487_vm1 }
 0x3f2   : > { %v1483_v30 = vsub.f32 1.0, %v1482_v1  ;;  %v1508_v1 = vor.u32 1.1754944e-38, %v1507_v25 }
 0x3f3   : > { %v1469_v7 = vmul.f32 %v2492_v41, %v1468_v20 }
 0x3f4   : > { %v1484_v39 = vmul.f32 %v2494_v36, %v1483_v30 }
 0x3f5   : > { %v2496_v18 = vpop.eup %2495  ;;  %v1470_v62 = vadd.f32 %v2492_v41, %v1469_v7 }
 0x3f6   : > { %v1497_v33 = vmul.f32 %v2496_v18, %v1465_v10  ;;  %v1485_v60 = vadd.f32 %v2494_v36, %v1484_v39  ;;  %v2498_v3 = vpop.eup %2497  ;;  %vm1502_vm8 = vweird.f32 %v2496_v18 }
 0x3f7   : > { %v1474_v42 = vsel %vm1473_vm4, %v2492_v41, %v1470_v62  ;;  %v1505_v41 = vand.u32 2147483647, %v1465_v10  ;;  %vm1503_vm10 = vmor %vm1501_vm9, %vm1502_vm8 }
 0x3f8   : > { %v1498_v27 = vsub.f32 1.0, %v1497_v33  ;;  %v1479_v43 = vsel %vm1476_vm6, %v1478_v48, %v1474_v42  ;;  %v1489_v34 = vsel %vm1488_vm5, %v2494_v36, %v1485_v60 }
 0x3f9   : > { %v1494_v37 = vsel %vm1491_vm7, %v1493_v8, %v1489_v34  ;;  %v1513_v53 = vmul.f32 %v2498_v3, %v1479_v43  ;;  %vm1506_vm11 = vcmp.eq.f32.partialorder %v1505_v41, 8.507059e+37 }
 0x3fa   : > { %v1499_v40 = vmul.f32 %v2496_v18, %v1498_v27  ;;  %v1512_v2 = vmul.f32 %v1494_v37, %v3321_v23 }
 0x3fc   : > { %v3361_v55 = vadd.f32 %v1513_v53, %v1512_v2  ;;  %v1500_v14 = vadd.f32 %v2496_v18, %v1499_v40 }
 0x3fe   : > { %2499 = vtanh.f32 %v3361_v55  ;;  %v1504_v47 = vsel %vm1503_vm10, %v2496_v18, %v1500_v14 }
 0x3ff   : > { %v1509_v20 = vsel %vm1506_vm11, %v1508_v1, %v1504_v47 }
 0x404   : > { %v2500_v36 = vpop.eup %2499 }
 0x405   : > { %v1516_v30 = vmul.f32 %v2500_v36, %v1509_v20 }
 0x407   : > { %1517 = vst [vmem:[#allocation2 + $0x8] sm:$0xff] %v1516_v30  ;;  %v1522_v54 = vpack.c.bf16 %v1516_v30, %v1516_v30 }
 0x409   : > { %1531 = vmatmul.bf16.vlgmr.msra.gmra.mxu0 %v1522_v54  ;;  %1544 = vmatmul.bf16.vlgmr.msra.gmra.mxu1 %v1522_v54 }
 0x40a   : > { %1557 = vmatmul.bf16.vlgmr.msra.gmra.mxu2 %v1522_v54  ;;  %1570 = vmatmul.bf16.vlgmr.msra.gmra.mxu3 %v1522_v54 }
 0x40b   : > { %1773 = vmatpush.bf16.msra.mxu0 %v2908_v46  ;;  %1786 = vmatpush.bf16.msra.mxu1 %v2913_v51 }
 0x40c   : > { %1799 = vmatpush.bf16.msra.mxu2 %v2920_v57  ;;  %1812 = vmatpush.bf16.msra.mxu3 %v2927_v61  ;;  %v3525_v57 = vld [vmem:[#allocation21_spill] sm:$0xff]  ;;  %v3526_v61 = vld [vmem:[#allocation22_spill] sm:$0xff] }
 0x40f   : > { %1774 = vmatpush.bf16.msra.mxu0 %v2923_v58  ;;  %1787 = vmatpush.bf16.msra.mxu1 %v2931_v63 }
 0x410   : > { %1800 = vmatpush.bf16.msra.mxu2 %v2939_v5  ;;  %1813 = vmatpush.bf16.msra.mxu3 %v2947_v9 }
 0x413   : > { %1775 = vmatpush.bf16.msra.mxu0 %v2943_v6  ;;  %1788 = vmatpush.bf16.msra.mxu1 %v2951_v11 }
 0x414   : > { %1801 = vmatpush.bf16.msra.mxu2 %v2959_v17  ;;  %1814 = vmatpush.bf16.msra.mxu3 %v2967_v22  ;;  %v3527_v17 = vld [vmem:[#allocation23_spill] sm:$0xff] }
 0x417   : > { %1776 = vmatpush.bf16.msra.mxu0 %v2963_v19  ;;  %1789 = vmatpush.bf16.msra.mxu1 %v2971_v24 }
 0x418   : > { %1802 = vmatpush.bf16.msra.mxu2 %v2979_v31  ;;  %1815 = vmatpush.bf16.msra.mxu3 %v2987_v35 }
 0x41b   : > { %1777 = vmatpush.bf16.msra.mxu0 %v2983_v32  ;;  %1790 = vmatpush.bf16.msra.mxu1 %v2991_v38 }
 0x41c   : > { %1803 = vmatpush.bf16.msra.mxu2 %v2999_v44  ;;  %1816 = vmatpush.bf16.msra.mxu3 %v3007_v49 }
 0x41f   : > { %1778 = vmatpush.bf16.msra.mxu0 %v3003_v45  ;;  %1791 = vmatpush.bf16.msra.mxu1 %v3010_v50 }
 0x420   : > { %1804 = vmatpush.bf16.msra.mxu2 %v3013_v52  ;;  %1817 = vmatpush.bf16.msra.mxu3 %v3031_v4 }
 0x423   : > { %1779 = vmatpush.bf16.msra.mxu0 %v3020_v56  ;;  %1792 = vmatpush.bf16.msra.mxu1 %v3026_v0  ;;  %v3528_v0 = vld [vmem:[#allocation24_spill] sm:$0xff] }
 0x424   : > { %1805 = vmatpush.bf16.msra.mxu2 %v3037_v12  ;;  %1818 = vmatpush.bf16.msra.mxu3 %v3045_v16 }
 0x427   : > { %1780 = vmatpush.bf16.msra.mxu0 %v3043_v15  ;;  %1793 = vmatpush.bf16.msra.mxu1 %v3050_v21 }
 0x428   : > { %1806 = vmatpush.bf16.msra.mxu2 %v3055_v28  ;;  %1819 = vmatpush.bf16.msra.mxu3 %v3059_v29 }
 0x486   : > { %v1532_v46 = vpop.f32.mrf.mxu0  ;;  %v1545_v51 = vpop.f32.mrf.mxu1 }
 0x487   : > { %v1575_v58 = vadd.f32 %v1532_v46, %v3525_v57  ;;  %v1576_v63 = vadd.f32 %v1545_v51, %v3526_v61  ;;  %v3529_v46 = vld [vmem:[#allocation25_spill] sm:$0xff]  ;;  %v3530_v57 = vld [vmem:[#allocation26_spill] sm:$0xff] }
 0x489   : > { %v2296_v5 = vmul.f32 -1.442695, %v1575_v58  ;;  %v2297_v6 = vmul.f32 -1.442695, %v1576_v63 }
 0x48b   : > { %2501 = vpow2.f32 %v2296_v5 }
 0x48c   : > { %2503 = vpow2.f32 %v2297_v6 }
 0x48d   : > { %v1558_v9 = vpop.f32.mrf.mxu2  ;;  %v1571_v11 = vpop.f32.mrf.mxu3 }
 0x48e   : > { %v1577_v19 = vadd.f32 %v1558_v9, %v3527_v17  ;;  %v1534_v22 = vpop.f32.mrf.mxu0  ;;  %v1547_v24 = vpop.f32.mrf.mxu1  ;;  %v1578_v4 = vadd.f32 %v1571_v11, %v3528_v0  ;;  %v3531_v9 = vld [vmem:[#allocation27_spill] sm:$0xff] }
 0x490   : > { %v2298_v31 = vmul.f32 -1.442695, %v1577_v19 }
 0x491   : > { %v2502_v32 = vpop.eup %2501 }
 0x492   : > { %v2504_v35 = vpop.eup %2503  ;;  %v1588_v38 = vadd.f32 1.0, %v2502_v32  ;;  %2505 = vpow2.f32 %v2298_v31 }
 0x493   : > { %v1589_v44 = vadd.f32 1.0, %v2504_v35 }
 0x494   : > { %2507 = vrcp.f32 %v1588_v38  ;;  %v1602_v29 = vand.u32 2147483648, %v1588_v38  ;;  %v1600_v59 = vand.u32 2147483647, %v1588_v38  ;;  %vm1596_vm14 = vweird.f32 %v1588_v38 }
 0x495   : > { %2509 = vrcp.f32 %v1589_v44  ;;  %v1560_v45 = vpop.f32.mrf.mxu2  ;;  %v1573_v49 = vpop.f32.mrf.mxu3  ;;  %v1617_v23 = vand.u32 2147483648, %v1589_v44  ;;  %v1615_v26 = vand.u32 2147483647, %v1589_v44  ;;  %vm1611_vm15 = vweird.f32 %v1589_v44 }
 0x496   : > { %v1603_v62 = vor.u32 1.1754944e-38, %v1602_v29  ;;  %vm1601_vm2 = vcmp.eq.f32.partialorder %v1600_v59, 8.507059e+37 }
 0x497   : > { %v1618_v48 = vor.u32 1.1754944e-38, %v1617_v23  ;;  %vm1616_vm3 = vcmp.eq.f32.partialorder %v1615_v26, 8.507059e+37 }
 0x498   : > { %v2506_v50 = vpop.eup %2505 }
 0x499   : > { %v1590_v52 = vadd.f32 1.0, %v2506_v50 }
 0x49a   : > { %v2508_v56 = vpop.eup %2507 }
 0x49b   : > { %v2510_v12 = vpop.eup %2509  ;;  %v1592_v15 = vmul.f32 %v2508_v56, %v1588_v38  ;;  %2511 = vrcp.f32 %v1590_v52  ;;  %vm1597_vm12 = vweird.f32 %v2508_v56  ;;  %v1632_v14 = vand.u32 2147483648, %v1590_v52 }
 0x49c   : > { %v1607_v16 = vmul.f32 %v2510_v12, %v1589_v44  ;;  %2513 = vtanh.f32 %v1578_v4  ;;  %vm1612_vm13 = vweird.f32 %v2510_v12  ;;  %vm1598_vm0 = vmor %vm1596_vm14, %vm1597_vm12  ;;  %vm1626_vm5 = vweird.f32 %v1590_v52 }
 0x49d   : > { %v1593_v21 = vsub.f32 1.0, %v1592_v15  ;;  %vm1613_vm1 = vmor %vm1611_vm15, %vm1612_vm13  ;;  %v1630_v25 = vand.u32 2147483647, %v1590_v52  ;;  %v1633_v47 = vor.u32 1.1754944e-38, %v1632_v14 }
 0x49e   : > { %v1608_v28 = vsub.f32 1.0, %v1607_v16 }
 0x49f   : > { %v1594_v10 = vmul.f32 %v2508_v56, %v1593_v21  ;;  %vm1631_vm7 = vcmp.eq.f32.partialorder %v1630_v25, 8.507059e+37 }
 0x4a0   : > { %v1609_v7 = vmul.f32 %v2510_v12, %v1608_v28 }
 0x4a1   : > { %v2512_v39 = vpop.eup %2511  ;;  %v1595_v13 = vadd.f32 %v2508_v56, %v1594_v10 }
 0x4a2   : > { %v1622_v18 = vmul.f32 %v2512_v39, %v1590_v52  ;;  %v1610_v33 = vadd.f32 %v2510_v12, %v1609_v7  ;;  %v2514_v8 = vpop.eup %2513  ;;  %vm1627_vm4 = vweird.f32 %v2512_v39  ;;  %v3532_v52 = vld [vmem:[#allocation28_spill] sm:$0xff] }
 0x4a3   : > { %v1599_v60 = vsel %vm1598_vm0, %v2508_v56, %v1595_v13  ;;  %vm1628_vm6 = vmor %vm1626_vm5, %vm1627_vm4 }
 0x4a4   : > { %v1623_v42 = vsub.f32 1.0, %v1622_v18  ;;  %v1604_v3 = vsel %vm1601_vm2, %v1603_v62, %v1599_v60  ;;  %v1614_v27 = vsel %vm1613_vm1, %v2510_v12, %v1610_v33 }
 0x4a5   : > { %v1619_v43 = vsel %vm1616_vm3, %v1618_v48, %v1614_v27  ;;  %v1638_v34 = vmul.f32 %v2514_v8, %v1604_v3 }
 0x4a6   : > { %v1624_v37 = vmul.f32 %v2512_v39, %v1623_v42  ;;  %v1637_v53 = vmul.f32 %v1619_v43, %v3361_v55 }
 0x4a8   : > { %v3401_v40 = vadd.f32 %v1638_v34, %v1637_v53  ;;  %v1625_v2 = vadd.f32 %v2512_v39, %v1624_v37 }
 0x4aa   : > { %2515 = vtanh.f32 %v3401_v40  ;;  %v1629_v41 = vsel %vm1628_vm6, %v2512_v39, %v1625_v2 }
 0x4ab   : > { %v1634_v36 = vsel %vm1631_vm7, %v1633_v47, %v1629_v41 }
 0x4b0   : > { %v2516_v1 = vpop.eup %2515 }
 0x4b1   : > { %v1641_v20 = vmul.f32 %v2516_v1, %v1634_v36 }
 0x4b3   : > { %1642 = vst [vmem:[#allocation2 + $0x20] sm:$0xff] %v1641_v20  ;;  %v1647_v30 = vpack.c.bf16 %v1641_v20, %v1641_v20 }
 0x4b5   : > { %1656 = vmatmul.bf16.vlgmr.msrb.gmra.mxu0 %v1647_v30  ;;  %1669 = vmatmul.bf16.vlgmr.msrb.gmra.mxu1 %v1647_v30 }
 0x4b6   : > { %1682 = vmatmul.bf16.vlgmr.msrb.gmra.mxu2 %v1647_v30  ;;  %1695 = vmatmul.bf16.vlgmr.msrb.gmra.mxu3 %v1647_v30 }
 0x532   : > { %v1657_v55 = vpop.f32.mrf.mxu0  ;;  %v1670_v54 = vpop.f32.mrf.mxu1 }
 0x533   : > { %v1700_v51 = vadd.f32 %v1657_v55, %v3529_v46  ;;  %v1701_v58 = vadd.f32 %v1670_v54, %v3530_v57  ;;  %v3533_v55 = vld [vmem:[#allocation29_spill] sm:$0xff]  ;;  %v3534_v46 = vld [vmem:[#allocation30_spill] sm:$0xff] }
 0x535   : > { %v2299_v61 = vmul.f32 -1.442695, %v1700_v51  ;;  %v2300_v63 = vmul.f32 -1.442695, %v1701_v58 }
 0x537   : > { %2517 = vpow2.f32 %v2299_v61 }
 0x538   : > { %2519 = vpow2.f32 %v2300_v63 }
 0x539   : > { %v1683_v5 = vpop.f32.mrf.mxu2  ;;  %v1696_v6 = vpop.f32.mrf.mxu3 }
 0x53a   : > { %v1702_v11 = vadd.f32 %v1683_v5, %v3531_v9  ;;  %v1659_v17 = vpop.f32.mrf.mxu0  ;;  %v1672_v19 = vpop.f32.mrf.mxu1  ;;  %v1703_v56 = vadd.f32 %v1696_v6, %v3532_v52  ;;  %v3535_v5 = vld [vmem:[#allocation31_spill] sm:$0xff] }
 0x53c   : > { %v2301_v22 = vmul.f32 -1.442695, %v1702_v11 }
 0x53d   : > { %v2518_v24 = vpop.eup %2517 }
 0x53e   : > { %v2520_v31 = vpop.eup %2519  ;;  %v1713_v32 = vadd.f32 1.0, %v2518_v24  ;;  %2521 = vpow2.f32 %v2301_v22 }
 0x53f   : > { %v1714_v35 = vadd.f32 1.0, %v2520_v31 }
 0x540   : > { %2523 = vrcp.f32 %v1713_v32  ;;  %v1727_v21 = vand.u32 2147483648, %v1713_v32  ;;  %v1725_v23 = vand.u32 2147483647, %v1713_v32  ;;  %vm1721_vm10 = vweird.f32 %v1713_v32 }
 0x541   : > { %2525 = vrcp.f32 %v1714_v35  ;;  %v1685_v38 = vpop.f32.mrf.mxu2  ;;  %v1698_v44 = vpop.f32.mrf.mxu3  ;;  %v1742_v28 = vand.u32 2147483648, %v1714_v35  ;;  %v1740_v59 = vand.u32 2147483647, %v1714_v35  ;;  %vm1736_vm11 = vweird.f32 %v1714_v35 }
 0x542   : > { %v1728_v13 = vor.u32 1.1754944e-38, %v1727_v21  ;;  %vm1726_vm14 = vcmp.eq.f32.partialorder %v1725_v23, 8.507059e+37 }
 0x543   : > { %v1743_v62 = vor.u32 1.1754944e-38, %v1742_v28  ;;  %vm1741_vm15 = vcmp.eq.f32.partialorder %v1740_v59, 8.507059e+37 }
 0x544   : > { %v2522_v45 = vpop.eup %2521 }
 0x545   : > { %v1715_v49 = vadd.f32 1.0, %v2522_v45 }
 0x546   : > { %v2524_v50 = vpop.eup %2523 }
 0x547   : > { %v2526_v0 = vpop.eup %2525  ;;  %v1717_v4 = vmul.f32 %v2524_v50, %v1713_v32  ;;  %2527 = vrcp.f32 %v1715_v49  ;;  %vm1722_vm8 = vweird.f32 %v2524_v50  ;;  %v1757_v2 = vand.u32 2147483648, %v1715_v49 }
 0x548   : > { %v1732_v12 = vmul.f32 %v2526_v0, %v1714_v35  ;;  %2529 = vtanh.f32 %v1703_v56  ;;  %vm1737_vm9 = vweird.f32 %v2526_v0  ;;  %vm1723_vm12 = vmor %vm1721_vm10, %vm1722_vm8  ;;  %vm1751_vm1 = vweird.f32 %v1715_v49 }
 0x549   : > { %v1718_v15 = vsub.f32 1.0, %v1717_v4  ;;  %vm1738_vm13 = vmor %vm1736_vm11, %vm1737_vm9  ;;  %v1755_v14 = vand.u32 2147483647, %v1715_v49  ;;  %v1758_v41 = vor.u32 1.1754944e-38, %v1757_v2 }
 0x54a   : > { %v1733_v16 = vsub.f32 1.0, %v1732_v12 }
 0x54b   : > { %v1719_v29 = vmul.f32 %v2524_v50, %v1718_v15  ;;  %vm1756_vm3 = vcmp.eq.f32.partialorder %v1755_v14, 8.507059e+37 }
 0x54c   : > { %v1734_v10 = vmul.f32 %v2526_v0, %v1733_v16 }
 0x54d   : > { %v2528_v7 = vpop.eup %2527  ;;  %v1720_v26 = vadd.f32 %v2524_v50, %v1719_v29 }
 0x54e   : > { %v1747_v39 = vmul.f32 %v2528_v7, %v1715_v49  ;;  %v1735_v18 = vadd.f32 %v2526_v0, %v1734_v10  ;;  %v2530_v48 = vpop.eup %2529  ;;  %vm1752_vm0 = vweird.f32 %v2528_v7  ;;  %v3536_v49 = vld [vmem:[#allocation32_spill] sm:$0xff] }
 0x54f   : > { %v1724_v33 = vsel %vm1723_vm12, %v2524_v50, %v1720_v26  ;;  %vm1753_vm2 = vmor %vm1751_vm1, %vm1752_vm0 }
 0x550   : > { %v1748_v60 = vsub.f32 1.0, %v1747_v39  ;;  %v1729_v8 = vsel %vm1726_vm14, %v1728_v13, %v1724_v33  ;;  %v1739_v42 = vsel %vm1738_vm13, %v2526_v0, %v1735_v18 }
 0x551   : > { %v1744_v3 = vsel %vm1741_vm15, %v1743_v62, %v1739_v42  ;;  %v1763_v27 = vmul.f32 %v2530_v48, %v1729_v8 }
 0x552   : > { %v1749_v43 = vmul.f32 %v2528_v7, %v1748_v60  ;;  %v1762_v34 = vmul.f32 %v1744_v3, %v3401_v40 }
 0x554   : > { %v3409_v37 = vadd.f32 %v1763_v27, %v1762_v34  ;;  %v1750_v53 = vadd.f32 %v2528_v7, %v1749_v43 }
 0x556   : > { %2531 = vtanh.f32 %v3409_v37  ;;  %v1754_v25 = vsel %vm1753_vm2, %v2528_v7, %v1750_v53 }
 0x557   : > { %v1759_v1 = vsel %vm1756_vm3, %v1758_v41, %v1754_v25 }
 0x55c   : > { %v2532_v47 = vpop.eup %2531 }
 0x55d   : > { %v1766_v36 = vmul.f32 %v2532_v47, %v1759_v1 }
 0x55f   : > { %1767 = vst [vmem:[#allocation2 + $0x28] sm:$0xff] %v1766_v36  ;;  %v1772_v20 = vpack.c.bf16 %v1766_v36, %v1766_v36 }
 0x561   : > { %1781 = vmatmul.bf16.vlgmr.msra.gmra.mxu0 %v1772_v20  ;;  %1794 = vmatmul.bf16.vlgmr.msra.gmra.mxu1 %v1772_v20 }
 0x562   : > { %1807 = vmatmul.bf16.vlgmr.msra.gmra.mxu2 %v1772_v20  ;;  %1820 = vmatmul.bf16.vlgmr.msra.gmra.mxu3 %v1772_v20 }
 0x5de   : > { %v1782_v40 = vpop.f32.mrf.mxu0  ;;  %v1795_v30 = vpop.f32.mrf.mxu1 }
 0x5df   : > { %v1825_v54 = vadd.f32 %v1782_v40, %v3533_v55  ;;  %v1826_v51 = vadd.f32 %v1795_v30, %v3534_v46 }
 0x5e1   : > { %v2302_v57 = vmul.f32 -1.442695, %v1825_v54  ;;  %v2303_v58 = vmul.f32 -1.442695, %v1826_v51 }
 0x5e3   : > { %2533 = vpow2.f32 %v2302_v57 }
 0x5e4   : > { %2535 = vpow2.f32 %v2303_v58 }
 0x5e5   : > { %v1808_v61 = vpop.f32.mrf.mxu2  ;;  %v1821_v63 = vpop.f32.mrf.mxu3 }
 0x5e6   : > { %v1827_v6 = vadd.f32 %v1808_v61, %v3535_v5  ;;  %v1784_v9 = vpop.f32.mrf.mxu0  ;;  %v1797_v11 = vpop.f32.mrf.mxu1  ;;  %v1828_v50 = vadd.f32 %v1821_v63, %v3536_v49 }
 0x5e8   : > { %v2304_v17 = vmul.f32 -1.442695, %v1827_v6 }
 0x5e9   : > { %v2534_v19 = vpop.eup %2533 }
 0x5ea   : > { %v2536_v22 = vpop.eup %2535  ;;  %v1838_v24 = vadd.f32 1.0, %v2534_v19  ;;  %2537 = vpow2.f32 %v2304_v17 }
 0x5eb   : > { %v1839_v31 = vadd.f32 1.0, %v2536_v22 }
 0x5ec   : > { %2539 = vrcp.f32 %v1838_v24  ;;  %v1852_v15 = vand.u32 2147483648, %v1838_v24  ;;  %v1850_v28 = vand.u32 2147483647, %v1838_v24  ;;  %vm1846_vm6 = vweird.f32 %v1838_v24 }
 0x5ed   : > { %2541 = vrcp.f32 %v1839_v31  ;;  %v1810_v32 = vpop.f32.mrf.mxu2  ;;  %v1823_v35 = vpop.f32.mrf.mxu3  ;;  %v1867_v16 = vand.u32 2147483648, %v1839_v31  ;;  %v1865_v23 = vand.u32 2147483647, %v1839_v31  ;;  %vm1861_vm7 = vweird.f32 %v1839_v31 }
 0x5ee   : > { %v1853_v26 = vor.u32 1.1754944e-38, %v1852_v15  ;;  %vm1851_vm10 = vcmp.eq.f32.partialorder %v1850_v28, 8.507059e+37 }
 0x5ef   : > { %v1868_v13 = vor.u32 1.1754944e-38, %v1867_v16  ;;  %vm1866_vm11 = vcmp.eq.f32.partialorder %v1865_v23, 8.507059e+37 }
 0x5f0   : > { %v2538_v38 = vpop.eup %2537 }
 0x5f1   : > { %v1840_v44 = vadd.f32 1.0, %v2538_v38 }
 0x5f2   : > { %v2540_v45 = vpop.eup %2539 }
 0x5f3   : > { %v2542_v52 = vpop.eup %2541  ;;  %v1842_v56 = vmul.f32 %v2540_v45, %v1838_v24  ;;  %2543 = vrcp.f32 %v1840_v44  ;;  %vm1847_vm4 = vweird.f32 %v2540_v45  ;;  %v1882_v53 = vand.u32 2147483648, %v1840_v44 }
 0x5f4   : > { %v1857_v0 = vmul.f32 %v2542_v52, %v1839_v31  ;;  %2545 = vtanh.f32 %v1828_v50  ;;  %vm1862_vm5 = vweird.f32 %v2542_v52  ;;  %vm1848_vm8 = vmor %vm1846_vm6, %vm1847_vm4  ;;  %vm1876_vm13 = vweird.f32 %v1840_v44 }
 0x5f5   : > { %v1843_v4 = vsub.f32 1.0, %v1842_v56  ;;  %vm1863_vm9 = vmor %vm1861_vm7, %vm1862_vm5  ;;  %v1880_v2 = vand.u32 2147483647, %v1840_v44  ;;  %v1883_v25 = vor.u32 1.1754944e-38, %v1882_v53 }
 0x5f6   : > { %v1858_v12 = vsub.f32 1.0, %v1857_v0 }
 0x5f7   : > { %v1844_v21 = vmul.f32 %v2540_v45, %v1843_v4  ;;  %vm1881_vm15 = vcmp.eq.f32.partialorder %v1880_v2, 8.507059e+37 }
 0x5f8   : > { %v1859_v29 = vmul.f32 %v2542_v52, %v1858_v12 }
 0x5f9   : > { %v2544_v10 = vpop.eup %2543  ;;  %v1845_v59 = vadd.f32 %v2540_v45, %v1844_v21 }
 0x5fa   : > { %v1872_v7 = vmul.f32 %v2544_v10, %v1840_v44  ;;  %v1860_v39 = vadd.f32 %v2542_v52, %v1859_v29  ;;  %v2546_v62 = vpop.eup %2545  ;;  %vm1877_vm12 = vweird.f32 %v2544_v10 }
 0x5fb   : > { %v1849_v18 = vsel %vm1848_vm8, %v2540_v45, %v1845_v59  ;;  %vm1878_vm14 = vmor %vm1876_vm13, %vm1877_vm12 }
 0x5fc   : > { %v1873_v33 = vsub.f32 1.0, %v1872_v7  ;;  %v1854_v48 = vsel %vm1851_vm10, %v1853_v26, %v1849_v18  ;;  %v1864_v60 = vsel %vm1863_vm9, %v2542_v52, %v1860_v39 }
 0x5fd   : > { %v1869_v8 = vsel %vm1866_vm11, %v1868_v13, %v1864_v60  ;;  %v1888_v42 = vmul.f32 %v2546_v62, %v1854_v48 }
 0x5fe   : > { %v1874_v3 = vmul.f32 %v2544_v10, %v1873_v33  ;;  %v1887_v27 = vmul.f32 %v1869_v8, %v3409_v37 }
 0x600   : > { %v1889_v43 = vadd.f32 %v1888_v42, %v1887_v27  ;;  %v1875_v34 = vadd.f32 %v2544_v10, %v1874_v3 }
 0x602   : > { %2547 = vtanh.f32 %v1889_v43  ;;  %v1879_v14 = vsel %vm1878_vm14, %v2544_v10, %v1875_v34 }
 0x603   : > { %v1884_v47 = vsel %vm1881_vm15, %v1883_v25, %v1879_v14 }
 0x607   : > { %1896 = sbr.rel (%p2305_p7) target bundleno = 1709 (0x6ad), region = 60 }
 0x608   : > { %v2548_v41 = vpop.eup %2547 }
 0x609   : > { %v1891_v1 = vmul.f32 %v2548_v41, %v1884_v47 }
 0x60b   : > { %1892 = vst [vmem:[#allocation2 + $0x38] sm:$0xff] %v1891_v1 }
 0x60c   : > { %v1912_v37 = vld [vmem:[%s3486_s4 + $0x78] sm:$0xff]  ;;  %v1911_v36 = vld [vmem:[%s3486_s4 + $0x70] sm:$0xff]  ;;  %v1910_v20 = vld [vmem:[%s3486_s4 + $0x68] sm:$0xff]  ;;  %v1914_v11 = vstv %s1913_s17  ;;  %vm1935_vm0 = vcmask 7168  }
 0x60d   : > { %1915 = vmatpush.msra.mxu0 %v1912_v37  ;;  %v1909_v40 = vld [vmem:[%s3486_s4 + $0x60] sm:$0xff]  ;;  %v1908_v30 = vld [vmem:[%s3486_s4 + $0x58] sm:$0xff]  ;;  %v1907_v55 = vld [vmem:[%s3486_s4 + $0x50] sm:$0xff] }
 0x60e   : > { %v1906_v54 = vld [vmem:[%s3486_s4 + $0x48] sm:$0xff]  ;;  %v1905_v46 = vld [vmem:[%s3486_s4 + $0x40] sm:$0xff]  ;;  %v1904_v51 = vld [vmem:[%s3486_s4 + $0x38] sm:$0xff] }
 0x60f   : > { %1916 = vmatpush.msra.mxu0 %v1911_v36  ;;  %v1903_v57 = vld [vmem:[%s3486_s4 + $0x30] sm:$0xff]  ;;  %v1902_v58 = vld [vmem:[%s3486_s4 + $0x28] sm:$0xff]  ;;  %v1901_v61 = vld [vmem:[%s3486_s4 + $0x20] sm:$0xff] }
 0x610   : > { %v1900_v63 = vld [vmem:[%s3486_s4 + $0x18] sm:$0xff]  ;;  %v1899_v5 = vld [vmem:[%s3486_s4 + $0x10] sm:$0xff]  ;;  %v1898_v6 = vld [vmem:[%s3486_s4 + $0x8] sm:$0xff] }
 0x611   : > { %1917 = vmatpush.msra.mxu0 %v1910_v20  ;;  %v1897_v9 = vld [vmem:[%s3486_s4] sm:$0xff] }
 0x613   : > { %1918 = vmatpush.msra.mxu0 %v1909_v40 }
 0x615   : > { %1919 = vmatpush.msra.mxu0 %v1908_v30 }
 0x617   : > { %1920 = vmatpush.msra.mxu0 %v1907_v55 }
 0x619   : > { %1921 = vmatpush.msra.mxu0 %v1906_v54 }
 0x61b   : > { %1922 = vmatpush.msra.mxu0 %v1905_v46 }
 0x61d   : > { %1923 = vmatpush.msra.mxu0 %v1904_v51 }
 0x61f   : > { %1924 = vmatpush.msra.mxu0 %v1903_v57 }
 0x621   : > { %1925 = vmatpush.msra.mxu0 %v1902_v58 }
 0x623   : > { %1926 = vmatpush.msra.mxu0 %v1901_v61 }
 0x625   : > { %1927 = vmatpush.msra.mxu0 %v1900_v63 }
 0x627   : > { %1928 = vmatpush.msra.mxu0 %v1899_v5 }
 0x629   : > { %1929 = vmatpush.msra.mxu0 %v1898_v6 }
 0x62b   : > { %1930 = vmatpush.msra.mxu0 %v1897_v9 }
 0x62c   : > { %1931 = vmatmul.f32.vlgmr.msra.gmra.mxu0 %v1891_v1 }
 0x6a9   : > { %v1932_v17 = vpop.f32.mrf.mxu0 }
 0x6aa   : > { %v1933_v19 = vadd.f32 %v1932_v17, %v1914_v11 }
 0x6ac   : > { %1936 = vst.msk [vmem:[%s3488_s6] sm:$0xff] %vm1935_vm0, %v1933_v19 }
 0x6ad PF: > { %p20_p2 = scmp.ge.s32.totalorder %s2712_s27, 5   ;;  %s3537_s23 = smov %s2639_s24 }
 0x6ae   : > { %s3538_s24 = smov %s2643_s25  ;;  %s3539_s25 = smov %s2722_s30 }
 0x6af   : > { %s3540_s26 = smov %s2712_s27  ;;  %22 = sbr.rel (!%p20_p2) target bundleno = 7 (0x7), region = 104 }
 0x6b4   :  { %1948 = vsyncpa [#allocation6], 1 }
 0x6b5   :  { %1950 = vsyncpa [#allocation6 + $0x1], 1 }
 0x6b6   :  { %1951 = vsyncpa [#allocation8], 1 }
 0x6b7   :  { %1953 = vsyncpa [#allocation8 + $0x1], 1 }

</bundles_post_ra>
